<compile_context>
chip_gen: v7x
topology: tpu7x:2x2x1
jax: 0.10.0
libtpu: 0.0.40
codegen_flags: <defaults>
</compile_context>

<pallas_src>
import jax
import jax.numpy as jnp
from jax.experimental import pallas as pl
from jax.experimental.pallas import tpu as pltpu

INPUT_DIM = 1536
HIDDEN1 = 256
HIDDEN2 = 1024
HIDDEN3 = 256
OUTPUT_DIM = 3
OUT_PAD = 128     # pad final layer's output dim to a lane-friendly width; slice outside
TB_MAX = 512      # batch tile (sized for v7x's 64 MiB VMEM; fits v5e/v6e easily)


def _round_up(n, m):
    return ((n + m - 1) // m) * m


def mlp_kernel(x_ref, w1_ref, b1_ref, w2_ref, b2_ref, w3_ref, b3_ref,
               w4_ref, b4_ref, o_ref):
    bf16 = jnp.bfloat16
    # Layer 1: (TB, 1536)bf16 @ (1536, 256)bf16 -> f32 acc, +b, ReLU
    h = jnp.dot(x_ref[...], w1_ref[...], preferred_element_type=jnp.float32)
    h = jnp.maximum(h + b1_ref[...], 0.0)
    # Layer 2: (TB, 256) @ (256, 1024)
    h = jnp.dot(h.astype(bf16), w2_ref[...], preferred_element_type=jnp.float32)
    h = jnp.maximum(h + b2_ref[...], 0.0)
    # Layer 3: (TB, 1024) @ (1024, 256)
    h = jnp.dot(h.astype(bf16), w3_ref[...], preferred_element_type=jnp.float32)
    h = jnp.maximum(h + b3_ref[...], 0.0)
    # Layer 4 (no activation): (TB, 256) @ (256, OUT_PAD)
    o_ref[...] = (jnp.dot(h.astype(bf16), w4_ref[...],
                          preferred_element_type=jnp.float32) + b4_ref[...])


def prepare_kernel_params(params_f32):
    """One-time conversion: bf16 weights (pre-transposed to (in, out)), f32 2-D
    biases, last layer zero-padded to OUT_PAD lanes.  Hoisted off the forward path."""
    w1, b1, w2, b2, w3, b3, w4, b4 = params_f32
    bf16 = jnp.bfloat16
    w4p = jnp.zeros((HIDDEN3, OUT_PAD), jnp.float32).at[:, :OUTPUT_DIM].set(w4)
    b4p = jnp.zeros((1, OUT_PAD), jnp.float32).at[:, :OUTPUT_DIM].set(b4[None, :])
    return (w1.astype(bf16), b1[None, :].astype(jnp.float32),
            w2.astype(bf16), b2[None, :].astype(jnp.float32),
            w3.astype(bf16), b3[None, :].astype(jnp.float32),
            w4p.astype(bf16), b4p.astype(jnp.float32))


@jax.jit
def simple_nn_forward(x, kparams):
    """x: (B, 1536) float32. kparams: output of prepare_kernel_params.
    Returns (B, 3) float32."""
    w1, b1, w2, b2, w3, b3, w4p, b4p = kparams
    B = x.shape[0]

    # Batch tile: multiple of 16 (bf16 sublane packing), capped at TB_MAX.
    TB = min(TB_MAX, _round_up(B, 16))
    B_pad = _round_up(B, TB)
    num_tiles = B_pad // TB

    xb = x.astype(jnp.bfloat16)
    if B_pad != B:
        xb = jnp.pad(xb, ((0, B_pad - B), (0, 0)))

    # x / out are tiled over the batch grid; weights & biases use constant
    # index_maps so they are fetched once and stay VMEM-resident.
    const2d = lambda i: (0, 0)
    in_specs = [
        pl.BlockSpec((TB, INPUT_DIM), lambda i: (i, 0)),       # x tile
        pl.BlockSpec((INPUT_DIM, HIDDEN1), const2d),           # w1
        pl.BlockSpec((1, HIDDEN1), const2d),                   # b1
        pl.BlockSpec((HIDDEN1, HIDDEN2), const2d),             # w2
        pl.BlockSpec((1, HIDDEN2), const2d),                   # b2
        pl.BlockSpec((HIDDEN2, HIDDEN3), const2d),             # w3
        pl.BlockSpec((1, HIDDEN3), const2d),                   # b3
        pl.BlockSpec((HIDDEN3, OUT_PAD), const2d),             # w4 (padded)
        pl.BlockSpec((1, OUT_PAD), const2d),                   # b4 (padded)
    ]
    out_spec = pl.BlockSpec((TB, OUT_PAD), lambda i: (i, 0))

    out = pl.pallas_call(
        mlp_kernel,
        out_shape=jax.ShapeDtypeStruct((B_pad, OUT_PAD), jnp.float32),
        grid=(num_tiles,),
        in_specs=in_specs,
        out_specs=out_spec,
        compiler_params=pltpu.CompilerParams(
            dimension_semantics=("parallel",)),
    )(xb, w1, b1, w2, b2, w3, b3, w4p, b4p)
    return out[:B, :OUTPUT_DIM]


def init_params(key):
    """Deterministic init mimicking nn.Linear default (uniform +-1/sqrt(fan_in)).
    Weights stored as (in, out) == transpose of torch's (out, in)."""
    dims = [(INPUT_DIM, HIDDEN1), (HIDDEN1, HIDDEN2), (HIDDEN2, HIDDEN3),
            (HIDDEN3, OUTPUT_DIM)]
    params = []
    for (fan_in, fan_out) in dims:
        key, kw, kb = jax.random.split(key, 3)
        bound = 1.0 / jnp.sqrt(fan_in)
        w = jax.random.uniform(kw, (fan_in, fan_out), jnp.float32, -bound, bound)
        b = jax.random.uniform(kb, (fan_out,), jnp.float32, -bound, bound)
        params += [w, b]
    return tuple(params)


def reference_forward_bf16(x, params_f32):
    """Pure-JAX reference using the same bf16-input / f32-accumulate scheme."""
    w1, b1, w2, b2, w3, b3, w4, b4 = params_f32
    bf16 = jnp.bfloat16
    h = jnp.dot(x.astype(bf16), w1.astype(bf16),
                preferred_element_type=jnp.float32) + b1
    h = jnp.maximum(h, 0.0)
    h = jnp.dot(h.astype(bf16), w2.astype(bf16),
                preferred_element_type=jnp.float32) + b2
    h = jnp.maximum(h, 0.0)
    h = jnp.dot(h.astype(bf16), w3.astype(bf16),
                preferred_element_type=jnp.float32) + b3
    h = jnp.maximum(h, 0.0)
    return jnp.dot(h.astype(bf16), w4.astype(bf16),
                   preferred_element_type=jnp.float32) + b4


if __name__ == "__main__":
    key = jax.random.PRNGKey(0)
    key, kx1, kx2 = jax.random.split(key, 3)
    params = init_params(key)
    kparams = prepare_kernel_params(params)

    # Small latency-style batch (matches the torch dummy-input usage).
    B = 2
    x = jax.random.normal(kx1, (B, INPUT_DIM), jnp.float32)
    y = jax.block_until_ready(simple_nn_forward(x, kparams))
    y_ref = reference_forward_bf16(x, params)
    assert y.shape == (B, OUTPUT_DIM), y.shape
    assert jnp.allclose(y, y_ref, atol=1e-2, rtol=1e-2), "mismatch vs reference (B=2)"

    # Larger batch to exercise the multi-tile grid + padding path.
    B2 = 640
    x2 = jax.random.normal(kx2, (B2, INPUT_DIM), jnp.float32)
    y2 = jax.block_until_ready(simple_nn_forward(x2, kparams))
    y2_ref = reference_forward_bf16(x2, params)
    assert y2.shape == (B2, OUTPUT_DIM), y2.shape
    assert jnp.allclose(y2, y2_ref, atol=1e-2, rtol=1e-2), "mismatch vs reference (B=640)"

    print("KERNEL_OK")
</pallas_src>

<mosaic_0001>
module attributes {stable_mosaic.version = 11 : i64} {
  func.func @mlp_kernel(%arg0: i32, %arg1: memref<16x1536xbf16, #tpu.memory_space<vmem>>, %arg2: memref<1536x256xbf16, #tpu.memory_space<vmem>>, %arg3: memref<1x256xf32, #tpu.memory_space<vmem>>, %arg4: memref<256x1024xbf16, #tpu.memory_space<vmem>>, %arg5: memref<1x1024xf32, #tpu.memory_space<vmem>>, %arg6: memref<1024x256xbf16, #tpu.memory_space<vmem>>, %arg7: memref<1x256xf32, #tpu.memory_space<vmem>>, %arg8: memref<256x128xbf16, #tpu.memory_space<vmem>>, %arg9: memref<1x128xf32, #tpu.memory_space<vmem>>, %arg10: memref<16x128xf32, #tpu.memory_space<vmem>>) attributes {dimension_semantics = [#tpu.dimension_semantics<parallel>], iteration_bounds = array<i64: 1>, scalar_prefetch = 0 : i64, scratch_operands = 0 : i64, tpu.core_type = #tpu.core_type<tc>, window_params = [{transform_indices = @transform_0, window_bounds = array<i64: 16, 1536>}, {pipeline_mode = #tpu.pipeline_mode<synchronous>, transform_indices = @transform_1, window_bounds = array<i64: 1536, 256>}, {pipeline_mode = #tpu.pipeline_mode<synchronous>, transform_indices = @transform_2, window_bounds = array<i64: 1, 256>}, {pipeline_mode = #tpu.pipeline_mode<synchronous>, transform_indices = @transform_3, window_bounds = array<i64: 256, 1024>}, {pipeline_mode = #tpu.pipeline_mode<synchronous>, transform_indices = @transform_4, window_bounds = array<i64: 1, 1024>}, {pipeline_mode = #tpu.pipeline_mode<synchronous>, transform_indices = @transform_5, window_bounds = array<i64: 1024, 256>}, {pipeline_mode = #tpu.pipeline_mode<synchronous>, transform_indices = @transform_6, window_bounds = array<i64: 1, 256>}, {pipeline_mode = #tpu.pipeline_mode<synchronous>, transform_indices = @transform_7, window_bounds = array<i64: 256, 128>}, {pipeline_mode = #tpu.pipeline_mode<synchronous>, transform_indices = @transform_8, window_bounds = array<i64: 1, 128>}, {transform_indices = @transform_9, window_bounds = array<i64: 16, 128>}]} {
    %c0 = arith.constant 0 : index
    %c0_0 = arith.constant 0 : index
    %0 = vector.load %arg1[%c0, %c0_0] : memref<16x1536xbf16, #tpu.memory_space<vmem>>, vector<16x1536xbf16>
    %c0_1 = arith.constant 0 : index
    %c0_2 = arith.constant 0 : index
    %1 = vector.load %arg2[%c0_1, %c0_2] : memref<1536x256xbf16, #tpu.memory_space<vmem>>, vector<1536x256xbf16>
    %cst = arith.constant dense<0.000000e+00> : vector<16x256xf32>
    %2 = tpu.matmul %0, %1, %cst {dimension_numbers = #tpu.dot_dimension_numbers<[1], [0], [0], [1], [0, 0, 1, 1], [], []>} : vector<16x1536xbf16>, vector<1536x256xbf16>, vector<16x256xf32> -> vector<16x256xf32>
    %c0_3 = arith.constant 0 : index
    %c0_4 = arith.constant 0 : index
    %3 = vector.load %arg3[%c0_3, %c0_4] : memref<1x256xf32, #tpu.memory_space<vmem>>, vector<1x256xf32>
    %4 = vector.broadcast %3 : vector<1x256xf32> to vector<16x256xf32>
    %5 = arith.addf %2, %4 : vector<16x256xf32>
    %cst_5 = arith.constant 0.000000e+00 : f32
    %6 = vector.broadcast %cst_5 : f32 to vector<16x256xf32>
    %7 = arith.maximumf %5, %6 : vector<16x256xf32>
    %8 = arith.truncf %7 : vector<16x256xf32> to vector<16x256xbf16>
    %c0_6 = arith.constant 0 : index
    %c0_7 = arith.constant 0 : index
    %9 = vector.load %arg4[%c0_6, %c0_7] : memref<256x1024xbf16, #tpu.memory_space<vmem>>, vector<256x1024xbf16>
    %cst_8 = arith.constant dense<0.000000e+00> : vector<16x1024xf32>
    %10 = tpu.matmul %8, %9, %cst_8 {dimension_numbers = #tpu.dot_dimension_numbers<[1], [0], [0], [1], [0, 0, 1, 1], [], []>} : vector<16x256xbf16>, vector<256x1024xbf16>, vector<16x1024xf32> -> vector<16x1024xf32>
    %c0_9 = arith.constant 0 : index
    %c0_10 = arith.constant 0 : index
    %11 = vector.load %arg5[%c0_9, %c0_10] : memref<1x1024xf32, #tpu.memory_space<vmem>>, vector<1x1024xf32>
    %12 = vector.broadcast %11 : vector<1x1024xf32> to vector<16x1024xf32>
    %13 = arith.addf %10, %12 : vector<16x1024xf32>
    %cst_11 = arith.constant 0.000000e+00 : f32
    %14 = vector.broadcast %cst_11 : f32 to vector<16x1024xf32>
    %15 = arith.maximumf %13, %14 : vector<16x1024xf32>
    %16 = arith.truncf %15 : vector<16x1024xf32> to vector<16x1024xbf16>
    %c0_12 = arith.constant 0 : index
    %c0_13 = arith.constant 0 : index
    %17 = vector.load %arg6[%c0_12, %c0_13] : memref<1024x256xbf16, #tpu.memory_space<vmem>>, vector<1024x256xbf16>
    %cst_14 = arith.constant dense<0.000000e+00> : vector<16x256xf32>
    %18 = tpu.matmul %16, %17, %cst_14 {dimension_numbers = #tpu.dot_dimension_numbers<[1], [0], [0], [1], [0, 0, 1, 1], [], []>} : vector<16x1024xbf16>, vector<1024x256xbf16>, vector<16x256xf32> -> vector<16x256xf32>
    %c0_15 = arith.constant 0 : index
    %c0_16 = arith.constant 0 : index
    %19 = vector.load %arg7[%c0_15, %c0_16] : memref<1x256xf32, #tpu.memory_space<vmem>>, vector<1x256xf32>
    %20 = vector.broadcast %19 : vector<1x256xf32> to vector<16x256xf32>
    %21 = arith.addf %18, %20 : vector<16x256xf32>
    %cst_17 = arith.constant 0.000000e+00 : f32
    %22 = vector.broadcast %cst_17 : f32 to vector<16x256xf32>
    %23 = arith.maximumf %21, %22 : vector<16x256xf32>
    %24 = arith.truncf %23 : vector<16x256xf32> to vector<16x256xbf16>
    %c0_18 = arith.constant 0 : index
    %c0_19 = arith.constant 0 : index
    %25 = vector.load %arg8[%c0_18, %c0_19] : memref<256x128xbf16, #tpu.memory_space<vmem>>, vector<256x128xbf16>
    %cst_20 = arith.constant dense<0.000000e+00> : vector<16x128xf32>
    %26 = tpu.matmul %24, %25, %cst_20 {dimension_numbers = #tpu.dot_dimension_numbers<[1], [0], [0], [1], [0, 0, 1, 1], [], []>} : vector<16x256xbf16>, vector<256x128xbf16>, vector<16x128xf32> -> vector<16x128xf32>
    %c0_21 = arith.constant 0 : index
    %c0_22 = arith.constant 0 : index
    %27 = vector.load %arg9[%c0_21, %c0_22] : memref<1x128xf32, #tpu.memory_space<vmem>>, vector<1x128xf32>
    %28 = vector.broadcast %27 : vector<1x128xf32> to vector<16x128xf32>
    %29 = arith.addf %26, %28 : vector<16x128xf32>
    %c0_23 = arith.constant 0 : index
    %c0_24 = arith.constant 0 : index
    %30 = vector.load %arg10[%c0_23, %c0_24] : memref<16x128xf32, #tpu.memory_space<vmem>>, vector<16x128xf32>
    tpu.vector_store %arg10[%c0_23, %c0_24], %29 {strides = array<i32>} : memref<16x128xf32, #tpu.memory_space<vmem>>, vector<16x128xf32>,
    return
  }
  func.func @transform_0(%arg0: i32) -> (i32, i32) {
    %c0_i32 = arith.constant 0 : i32
    %c0_i32_0 = arith.constant 0 : i32
    return %arg0, %c0_i32 : i32, i32
  }
  func.func @transform_1(%arg0: i32) -> (i32, i32) {
    %c0_i32 = arith.constant 0 : i32
    %c0_i32_0 = arith.constant 0 : i32
    %c0_i32_1 = arith.constant 0 : i32
    return %c0_i32, %c0_i32_0 : i32, i32
  }
  func.func @transform_2(%arg0: i32) -> (i32, i32) {
    %c0_i32 = arith.constant 0 : i32
    %c0_i32_0 = arith.constant 0 : i32
    %c0_i32_1 = arith.constant 0 : i32
    return %c0_i32, %c0_i32_0 : i32, i32
  }
  func.func @transform_3(%arg0: i32) -> (i32, i32) {
    %c0_i32 = arith.constant 0 : i32
    %c0_i32_0 = arith.constant 0 : i32
    %c0_i32_1 = arith.constant 0 : i32
    return %c0_i32, %c0_i32_0 : i32, i32
  }
  func.func @transform_4(%arg0: i32) -> (i32, i32) {
    %c0_i32 = arith.constant 0 : i32
    %c0_i32_0 = arith.constant 0 : i32
    %c0_i32_1 = arith.constant 0 : i32
    return %c0_i32, %c0_i32_0 : i32, i32
  }
  func.func @transform_5(%arg0: i32) -> (i32, i32) {
    %c0_i32 = arith.constant 0 : i32
    %c0_i32_0 = arith.constant 0 : i32
    %c0_i32_1 = arith.constant 0 : i32
    return %c0_i32, %c0_i32_0 : i32, i32
  }
  func.func @transform_6(%arg0: i32) -> (i32, i32) {
    %c0_i32 = arith.constant 0 : i32
    %c0_i32_0 = arith.constant 0 : i32
    %c0_i32_1 = arith.constant 0 : i32
    return %c0_i32, %c0_i32_0 : i32, i32
  }
  func.func @transform_7(%arg0: i32) -> (i32, i32) {
    %c0_i32 = arith.constant 0 : i32
    %c0_i32_0 = arith.constant 0 : i32
    %c0_i32_1 = arith.constant 0 : i32
    return %c0_i32, %c0_i32_0 : i32, i32
  }
  func.func @transform_8(%arg0: i32) -> (i32, i32) {
    %c0_i32 = arith.constant 0 : i32
    %c0_i32_0 = arith.constant 0 : i32
    %c0_i32_1 = arith.constant 0 : i32
    return %c0_i32, %c0_i32_0 : i32, i32
  }
  func.func @transform_9(%arg0: i32) -> (i32, i32) {
    %c0_i32 = arith.constant 0 : i32
    %c0_i32_0 = arith.constant 0 : i32
    return %arg0, %c0_i32 : i32, i32
  }
}

</mosaic_0001>

<bundles_post_ra>
// kernel: simple_nn_forward.1
= control target key start
LH: loop header
LB: loop body
LE: loop exit
PB: predicated region body
PF: predicated region fallthrough
CT: control target
= control target key end

     0   :  { %14 = vsyncpa [#allocation3], 0  ;;  %s5098_s0 = inlined_call_operand.vmem [shape: bf16[16,1536], index: 0, kind: input, shape index: {}]   ;;  %s5099_s1 = inlined_call_operand.hbm [shape: bf16[1536,256], index: 1, kind: input, shape index: {}]   ;;  %s5100_s2 = inlined_call_operand.vmem [shape: f32[1,256], index: 2, kind: input, shape index: {}]   ;;  %s5101_s3 = inlined_call_operand.hbm [shape: bf16[256,1024], index: 3, kind: input, shape index: {}]   ;;  %s5102_s4 = inlined_call_operand.vmem [shape: f32[1,1024], index: 4, kind: input, shape index: {}]   ;;  %s5103_s5 = inlined_call_operand.hbm [shape: bf16[1024,256], index: 5, kind: input, shape index: {}]   ;;  %s5104_s6 = inlined_call_operand.vmem [shape: f32[1,256], index: 6, kind: input, shape index: {}]   ;;  %s5105_s7 = inlined_call_operand.vmem [shape: bf16[256,128], index: 7, kind: input, shape index: {}]   ;;  %s5106_s8 = inlined_call_operand.vmem [shape: f32[1,128], index: 8, kind: input, shape index: {}]   ;;  %s5107_s9 = inlined_call_operand.vmem [shape: f32[16,128], index: 9, kind: output, shape index: {}]  }
   0x1   :  { %15 = vsyncpa [#allocation5], 0  ;;  %s4852_s30 = smov [#allocation4]   ;;  %s4782_s13 = scalar_lea.hbm %s5101_s3, 16384 }
   0x2   :  { %s37_s10 = sshll.u32 %s4852_s30, 4  ;;  %p4783_p0 = scmp.ne.s32.totalorder %s5101_s3, %s4782_s13  ;;  %s38_s10 = int_to_ptr.vmem [resolvable:$true] %s37_s10 }
   0x3   :  { %p4786_p1 = scmp.lt.u32.totalorder %s4782_s13, %s5101_s3 }
   0x5   :  { %p4788_p2 = pnand %p4786_p1, %p4783_p0 }
   0x7   :  { %4791 = shalt.err (!%p4788_p2)
}
   0x8   :  { %s4792_s18 = scalar_lea.vmem %s38_s10, 16384  ;;  %p4797_p4 = scmp.lt.s32.totalorder %s38_s10, %s38_s10 }
   0x9   :  { %p4793_p3 = scmp.ne.s32.totalorder %s38_s10, %s4792_s18  ;;  %p4798_p5 = scmp.lt.s32.totalorder %s4792_s18, %s4792_s18 }
   0xb   :  { %p4799_p6 = por %p4798_p5, %p4797_p4 }
   0xd   :  { %p4800_p7 = pnand %p4799_p6, %p4793_p3 }
   0xf   :  { %4803 = shalt.err (!%p4800_p7)
}
  0x10   :  { %s4853_s19 = smov 512   ;;  %s4854_s20 = smov 32  }
  0x11   :  { %43 = dma.hbm_to_vmem [thread:$0]  %s5101_s3, 16384, %s38_s10, [#allocation5], %s4853_s19, %s4853_s19, %s4854_s20  }
  0x12   :  { %s4855_s23 = smov [#allocation2]   ;;  %s4804_s27 = scalar_lea.hbm %s5099_s1, 24576 }
  0x13   :  { %s23_s24 = sshll.u32 %s4855_s23, 4  ;;  %p4805_p8 = scmp.ne.s32.totalorder %s5099_s1, %s4804_s27  ;;  %s24_s24 = int_to_ptr.vmem [resolvable:$true] %s23_s24 }
  0x14   :  { %p4808_p9 = scmp.lt.u32.totalorder %s4804_s27, %s5099_s1 }
  0x16   :  { %p4810_p10 = pnand %p4808_p9, %p4805_p8 }
  0x18   :  { %4813 = shalt.err (!%p4810_p10)
}
  0x19   :  { %s4814_s12 = scalar_lea.vmem %s24_s24, 24576  ;;  %p4819_p12 = scmp.lt.s32.totalorder %s24_s24, %s24_s24 }
  0x1a   :  { %p4815_p11 = scmp.ne.s32.totalorder %s24_s24, %s4814_s12  ;;  %p4820_p13 = scmp.lt.s32.totalorder %s4814_s12, %s4814_s12 }
  0x1c   :  { %p4821_p0 = por %p4820_p13, %p4819_p12 }
  0x1e   :  { %p4822_p1 = pnand %p4821_p0, %p4815_p11 }
  0x20   :  { %4825 = shalt.err (!%p4822_p1)
}
  0x21   :  { %s4856_s3 = smov 128   ;;  %s4857_s10 = smov 8  }
  0x22   :  { %29 = dma.hbm_to_vmem [thread:$0]  %s5099_s1, 24576, %s24_s24, [#allocation3], %s4856_s3, %s4856_s3, %s4857_s10  }
  0x23   :  { %s4858_s15 = smov [#allocation6]   ;;  %s4826_s19 = scalar_lea.hbm %s5103_s5, 16384 }
  0x24   :  { %s51_s16 = sshll.u32 %s4858_s15, 4  ;;  %p4827_p2 = scmp.ne.s32.totalorder %s5103_s5, %s4826_s19  ;;  %s52_s16 = int_to_ptr.vmem [resolvable:$true] %s51_s16 }
  0x25   :  { %p4830_p3 = scmp.lt.u32.totalorder %s4826_s19, %s5103_s5 }
  0x27   :  { %p4832_p4 = pnand %p4830_p3, %p4827_p2 }
  0x29   :  { %4835 = shalt.err (!%p4832_p4)
}
  0x2a   :  { %s4836_s25 = scalar_lea.vmem %s52_s16, 16384  ;;  %p4841_p6 = scmp.lt.s32.totalorder %s52_s16, %s52_s16 }
  0x2b   :  { %p4837_p5 = scmp.ne.s32.totalorder %s52_s16, %s4836_s25  ;;  %p4842_p7 = scmp.lt.s32.totalorder %s4836_s25, %s4836_s25 }
  0x2d   :  { %p4843_p8 = por %p4842_p7, %p4841_p6 }
  0x2f   :  { %p4844_p9 = pnand %p4843_p8, %p4837_p5 }
  0x31   :  { %4847 = shalt.err (!%p4844_p9)
}
  0x32   :  { %57 = dma.hbm_to_vmem [thread:$0]  %s5103_s5, 16384, %s52_s16, [#allocation5], %s4856_s3, %s4856_s3, %s4857_s10  }
  0x33   :  { %4848 = dma.done.wait [#allocation3], 24576  }
  0x34   :  { %4849 = vsyncadd [#allocation3], 4294942720 }
  0x35   :  { %4850 = dma.done.wait [#allocation5], 32768  }
  0x36   :  { %4851 = vsyncadd [#allocation5], 4294934528  ;;  %v4268_v0 = vld [vmem:[#allocation2 + $0x4] ss:$8 sps:$4 sm:$0xff]   ;;  %v4270_v1 = vld [vmem:[#allocation2] ss:$8 sps:$4 sm:$0xff]  }
  0x37   :  { %1310 = vmatprep.subr.bf16.mxu0 %v4268_v0  ;;  %v4271_v2 = vld [vmem:[#allocation2 + $0x14] ss:$8 sps:$4 sm:$0xff]   ;;  %v4273_v3 = vld [vmem:[#allocation2 + $0x10] ss:$8 sps:$4 sm:$0xff]   ;;  %v4274_v4 = vld [vmem:[#allocation2 + $0x24] ss:$8 sps:$4 sm:$0xff]  }
  0x38   :  { %1311 = vmatpush1.bf16.msra.mxu0 %v4270_v1  ;;  %v4276_v5 = vld [vmem:[#allocation2 + $0x20] ss:$8 sps:$4 sm:$0xff]   ;;  %v4277_v6 = vld [vmem:[#allocation2 + $0x34] ss:$8 sps:$4 sm:$0xff]   ;;  %v4279_v7 = vld [vmem:[#allocation2 + $0x30] ss:$8 sps:$4 sm:$0xff]  }
  0x39   :  { %1312 = vmatprep.subr.bf16.mxu0 %v4271_v2  ;;  %v4280_v8 = vld [vmem:[#allocation2 + $0x44] ss:$8 sps:$4 sm:$0xff]   ;;  %v4282_v9 = vld [vmem:[#allocation2 + $0x40] ss:$8 sps:$4 sm:$0xff]   ;;  %v4283_v10 = vld [vmem:[#allocation2 + $0x54] ss:$8 sps:$4 sm:$0xff]  }
  0x3a   :  { %v4285_v11 = vld [vmem:[#allocation2 + $0x50] ss:$8 sps:$4 sm:$0xff]   ;;  %v4286_v12 = vld [vmem:[#allocation2 + $0x64] ss:$8 sps:$4 sm:$0xff]   ;;  %v4288_v14 = vld [vmem:[#allocation2 + $0x60] ss:$8 sps:$4 sm:$0xff]  }
  0x3b   :  { %v4318_v13 = vld [vmem:[%s5098_s0 + $0x4] ss:$48 sps:$4 sm:$0xff]   ;;  %v4291_v16 = vld [vmem:[#allocation2 + $0x70] ss:$8 sps:$4 sm:$0xff]   ;;  %v4294_v18 = vld [vmem:[#allocation2 + $0x80] ss:$8 sps:$4 sm:$0xff]  }
  0x3c   :  { %1313 = vmatpush1.bf16.msra.mxu0 %v4273_v3  ;;  %v4289_v15 = vld [vmem:[#allocation2 + $0x74] ss:$8 sps:$4 sm:$0xff]   ;;  %1342 = vmatprep.mubr.bf16.mxu0 %v4318_v13  ;;  %v4292_v17 = vld [vmem:[#allocation2 + $0x84] ss:$8 sps:$4 sm:$0xff]   ;;  %v4297_v20 = vld [vmem:[#allocation2 + $0x90] ss:$8 sps:$4 sm:$0xff]  }
  0x3d   :  { %1314 = vmatprep.subr.bf16.mxu0 %v4274_v4  ;;  %v4295_v19 = vld [vmem:[#allocation2 + $0x94] ss:$8 sps:$4 sm:$0xff]   ;;  %v4298_v21 = vld [vmem:[#allocation2 + $0xa4] ss:$8 sps:$4 sm:$0xff]   ;;  %v4300_v22 = vld [vmem:[#allocation2 + $0xa0] ss:$8 sps:$4 sm:$0xff]  }
  0x3e   :  { %v4301_v23 = vld [vmem:[#allocation2 + $0xb4] ss:$8 sps:$4 sm:$0xff]   ;;  %v4303_v24 = vld [vmem:[#allocation2 + $0xb0] ss:$8 sps:$4 sm:$0xff]   ;;  %v4304_v25 = vld [vmem:[#allocation2 + $0xc4] ss:$8 sps:$4 sm:$0xff]  }
  0x3f   :  { %v4306_v26 = vld [vmem:[#allocation2 + $0xc0] ss:$8 sps:$4 sm:$0xff]   ;;  %v4307_v27 = vld [vmem:[#allocation2 + $0xd4] ss:$8 sps:$4 sm:$0xff]   ;;  %v4309_v28 = vld [vmem:[#allocation2 + $0xd0] ss:$8 sps:$4 sm:$0xff]  }
  0x40   :  { %1315 = vmatpush1.bf16.msra.mxu0 %v4276_v5  ;;  %v4310_v29 = vld [vmem:[#allocation2 + $0xe4] ss:$8 sps:$4 sm:$0xff]   ;;  %v4312_v30 = vld [vmem:[#allocation2 + $0xe0] ss:$8 sps:$4 sm:$0xff]   ;;  %v4313_v31 = vld [vmem:[#allocation2 + $0xf4] ss:$8 sps:$4 sm:$0xff]  }
  0x41   :  { %1316 = vmatprep.subr.bf16.mxu0 %v4277_v6  ;;  %v4315_v32 = vld [vmem:[#allocation2 + $0xf0] ss:$8 sps:$4 sm:$0xff]   ;;  %v4321_v33 = vld [vmem:[#allocation2 + $0x104] ss:$8 sps:$4 sm:$0xff]   ;;  %v4319_v35 = vld [vmem:[#allocation2 + $0x100] ss:$8 sps:$4 sm:$0xff]  }
  0x42   :  { %v4316_v34 = vld [vmem:[%s5098_s0] ss:$48 sps:$4 sm:$0xff]   ;;  %v4369_v36 = vld [vmem:[%s5098_s0 + $0xc] ss:$48 sps:$4 sm:$0xff]   ;;  %v4367_v4 = vld [vmem:[%s5098_s0 + $0x8] ss:$48 sps:$4 sm:$0xff]  }
  0x43   :  { %v4324_v37 = vld [vmem:[#allocation2 + $0x114] ss:$8 sps:$4 sm:$0xff]   ;;  %v4322_v38 = vld [vmem:[#allocation2 + $0x110] ss:$8 sps:$4 sm:$0xff]   ;;  %v4327_v39 = vld [vmem:[#allocation2 + $0x124] ss:$8 sps:$4 sm:$0xff]  }
  0x44   :  { %1317 = vmatpush1.bf16.msra.mxu0 %v4279_v7  ;;  %v4325_v40 = vld [vmem:[#allocation2 + $0x120] ss:$8 sps:$4 sm:$0xff]   ;;  %v4330_v41 = vld [vmem:[#allocation2 + $0x134] ss:$8 sps:$4 sm:$0xff]   ;;  %v4328_v42 = vld [vmem:[#allocation2 + $0x130] ss:$8 sps:$4 sm:$0xff]  }
  0x45   :  { %1318 = vmatprep.subr.bf16.mxu0 %v4280_v8  ;;  %v4333_v43 = vld [vmem:[#allocation2 + $0x144] ss:$8 sps:$4 sm:$0xff]   ;;  %v4331_v44 = vld [vmem:[#allocation2 + $0x140] ss:$8 sps:$4 sm:$0xff]   ;;  %v4336_v45 = vld [vmem:[#allocation2 + $0x154] ss:$8 sps:$4 sm:$0xff]  }
  0x46   :  { %v4334_v46 = vld [vmem:[#allocation2 + $0x150] ss:$8 sps:$4 sm:$0xff]   ;;  %v4339_v47 = vld [vmem:[#allocation2 + $0x164] ss:$8 sps:$4 sm:$0xff]   ;;  %v4337_v48 = vld [vmem:[#allocation2 + $0x160] ss:$8 sps:$4 sm:$0xff]  }
  0x47   :  { %v4342_v49 = vld [vmem:[#allocation2 + $0x174] ss:$8 sps:$4 sm:$0xff]   ;;  %v4340_v50 = vld [vmem:[#allocation2 + $0x170] ss:$8 sps:$4 sm:$0xff]   ;;  %v4345_v51 = vld [vmem:[#allocation2 + $0x184] ss:$8 sps:$4 sm:$0xff]  }
  0x48   :  { %1319 = vmatpush1.bf16.msra.mxu0 %v4282_v9  ;;  %v4343_v52 = vld [vmem:[#allocation2 + $0x180] ss:$8 sps:$4 sm:$0xff]   ;;  %v4348_v53 = vld [vmem:[#allocation2 + $0x194] ss:$8 sps:$4 sm:$0xff]   ;;  %v4346_v54 = vld [vmem:[#allocation2 + $0x190] ss:$8 sps:$4 sm:$0xff]  }
  0x49   :  { %1320 = vmatprep.subr.bf16.mxu0 %v4283_v10  ;;  %v4351_v55 = vld [vmem:[#allocation2 + $0x1a4] ss:$8 sps:$4 sm:$0xff]   ;;  %v4349_v56 = vld [vmem:[#allocation2 + $0x1a0] ss:$8 sps:$4 sm:$0xff]   ;;  %v4354_v57 = vld [vmem:[#allocation2 + $0x1b4] ss:$8 sps:$4 sm:$0xff]  }
  0x4a   :  { %v4352_v58 = vld [vmem:[#allocation2 + $0x1b0] ss:$8 sps:$4 sm:$0xff]   ;;  %v4357_v59 = vld [vmem:[#allocation2 + $0x1c4] ss:$8 sps:$4 sm:$0xff]   ;;  %v4355_v60 = vld [vmem:[#allocation2 + $0x1c0] ss:$8 sps:$4 sm:$0xff]  }
  0x4b   :  { %v4360_v61 = vld [vmem:[#allocation2 + $0x1d4] ss:$8 sps:$4 sm:$0xff]   ;;  %v4358_v62 = vld [vmem:[#allocation2 + $0x1d0] ss:$8 sps:$4 sm:$0xff]   ;;  %v4363_v63 = vld [vmem:[#allocation2 + $0x1e4] ss:$8 sps:$4 sm:$0xff]  }
  0x4c   :  { %1321 = vmatpush1.bf16.msra.mxu0 %v4285_v11  ;;  %v4361_v0 = vld [vmem:[#allocation2 + $0x1e0] ss:$8 sps:$4 sm:$0xff]   ;;  %v4366_v1 = vld [vmem:[#allocation2 + $0x1f4] ss:$8 sps:$4 sm:$0xff]   ;;  %v4364_v2 = vld [vmem:[#allocation2 + $0x1f0] ss:$8 sps:$4 sm:$0xff]  }
  0x4d   :  { %1322 = vmatprep.subr.bf16.mxu0 %v4286_v12  ;;  %v4372_v3 = vld [vmem:[#allocation2 + $0x204] ss:$8 sps:$4 sm:$0xff]   ;;  %v4370_v5 = vld [vmem:[#allocation2 + $0x200] ss:$8 sps:$4 sm:$0xff]   ;;  %v4375_v7 = vld [vmem:[#allocation2 + $0x214] ss:$8 sps:$4 sm:$0xff]  }
  0x4e   :  { %v4420_v6 = vld [vmem:[%s5098_s0 + $0x14] ss:$48 sps:$4 sm:$0xff]   ;;  %v4373_v8 = vld [vmem:[#allocation2 + $0x210] ss:$8 sps:$4 sm:$0xff]   ;;  %v4376_v10 = vld [vmem:[#allocation2 + $0x220] ss:$8 sps:$4 sm:$0xff]  }
  0x4f   :  { %v4378_v9 = vld [vmem:[#allocation2 + $0x224] ss:$8 sps:$4 sm:$0xff]   ;;  %v4381_v11 = vld [vmem:[#allocation2 + $0x234] ss:$8 sps:$4 sm:$0xff]   ;;  %v4379_v12 = vld [vmem:[#allocation2 + $0x230] ss:$8 sps:$4 sm:$0xff]  }
  0x50   :  { %1323 = vmatpush1.bf16.msra.mxu0 %v4288_v14  ;;  %v4384_v13 = vld [vmem:[#allocation2 + $0x244] ss:$8 sps:$4 sm:$0xff]   ;;  %v4382_v14 = vld [vmem:[#allocation2 + $0x240] ss:$8 sps:$4 sm:$0xff]  }
  0x51   :  { %1324 = vmatprep.subr.bf16.mxu0 %v4289_v15  ;;  %v4387_v15 = vld [vmem:[#allocation2 + $0x254] ss:$8 sps:$4 sm:$0xff]  }
  0x54   :  { %1325 = vmatpush1.bf16.msra.mxu0 %v4291_v16  ;;  %v4385_v16 = vld [vmem:[#allocation2 + $0x250] ss:$8 sps:$4 sm:$0xff]  }
  0x55   :  { %1326 = vmatprep.subr.bf16.mxu0 %v4292_v17  ;;  %v4390_v17 = vld [vmem:[#allocation2 + $0x264] ss:$8 sps:$4 sm:$0xff]  }
  0x58   :  { %1327 = vmatpush1.bf16.msra.mxu0 %v4294_v18  ;;  %v4388_v18 = vld [vmem:[#allocation2 + $0x260] ss:$8 sps:$4 sm:$0xff]  }
  0x59   :  { %1328 = vmatprep.subr.bf16.mxu0 %v4295_v19  ;;  %v4393_v19 = vld [vmem:[#allocation2 + $0x274] ss:$8 sps:$4 sm:$0xff]  }
  0x5c   :  { %1329 = vmatpush1.bf16.msra.mxu0 %v4297_v20  ;;  %v4391_v20 = vld [vmem:[#allocation2 + $0x270] ss:$8 sps:$4 sm:$0xff]  }
  0x5d   :  { %1330 = vmatprep.subr.bf16.mxu0 %v4298_v21  ;;  %v4396_v21 = vld [vmem:[#allocation2 + $0x284] ss:$8 sps:$4 sm:$0xff]  }
  0x60   :  { %1331 = vmatpush1.bf16.msra.mxu0 %v4300_v22  ;;  %v4394_v22 = vld [vmem:[#allocation2 + $0x280] ss:$8 sps:$4 sm:$0xff]  }
  0x61   :  { %1332 = vmatprep.subr.bf16.mxu0 %v4301_v23  ;;  %v4399_v23 = vld [vmem:[#allocation2 + $0x294] ss:$8 sps:$4 sm:$0xff]  }
  0x64   :  { %1333 = vmatpush1.bf16.msra.mxu0 %v4303_v24  ;;  %v4397_v24 = vld [vmem:[#allocation2 + $0x290] ss:$8 sps:$4 sm:$0xff]  }
  0x65   :  { %1334 = vmatprep.subr.bf16.mxu0 %v4304_v25  ;;  %v4402_v25 = vld [vmem:[#allocation2 + $0x2a4] ss:$8 sps:$4 sm:$0xff]  }
  0x68   :  { %1335 = vmatpush1.bf16.msra.mxu0 %v4306_v26  ;;  %v4400_v26 = vld [vmem:[#allocation2 + $0x2a0] ss:$8 sps:$4 sm:$0xff]  }
  0x69   :  { %1336 = vmatprep.subr.bf16.mxu0 %v4307_v27  ;;  %v4405_v27 = vld [vmem:[#allocation2 + $0x2b4] ss:$8 sps:$4 sm:$0xff]  }
  0x6c   :  { %1337 = vmatpush1.bf16.msra.mxu0 %v4309_v28  ;;  %v4403_v28 = vld [vmem:[#allocation2 + $0x2b0] ss:$8 sps:$4 sm:$0xff]  }
  0x6d   :  { %1338 = vmatprep.subr.bf16.mxu0 %v4310_v29  ;;  %v4408_v29 = vld [vmem:[#allocation2 + $0x2c4] ss:$8 sps:$4 sm:$0xff]  }
  0x70   :  { %1339 = vmatpush1.bf16.msra.mxu0 %v4312_v30  ;;  %v4406_v30 = vld [vmem:[#allocation2 + $0x2c0] ss:$8 sps:$4 sm:$0xff]  }
  0x71   :  { %1340 = vmatprep.subr.bf16.mxu0 %v4313_v31  ;;  %v4411_v31 = vld [vmem:[#allocation2 + $0x2d4] ss:$8 sps:$4 sm:$0xff]  }
  0x74   :  { %1341 = vmatpush1.bf16.msra.mxu0 %v4315_v32  ;;  %v4409_v32 = vld [vmem:[#allocation2 + $0x2d0] ss:$8 sps:$4 sm:$0xff]  }
  0x75   :  { %1353 = vmatprep.subr.bf16.mxu0 %v4321_v33  ;;  %v4414_v33 = vld [vmem:[#allocation2 + $0x2e4] ss:$8 sps:$4 sm:$0xff]  }
  0x77   :  { %1343 = vmatmul.mubr.bf16.vlgmr.msra.gmra.mrb[0].mxu0 %v4316_v34  ;;  %v4412_v34 = vld [vmem:[#allocation2 + $0x2e0] ss:$8 sps:$4 sm:$0xff]  }
  0x78   :  { %1354 = vmatpush1.bf16.msra.mxu0 %v4319_v35  ;;  %1385 = vmatprep.mubr.bf16.mxu0 %v4369_v36  ;;  %v4417_v35 = vld [vmem:[#allocation2 + $0x2f4] ss:$8 sps:$4 sm:$0xff]   ;;  %v4415_v36 = vld [vmem:[#allocation2 + $0x2f0] ss:$8 sps:$4 sm:$0xff]  }
  0x79   :  { %1355 = vmatprep.subr.bf16.mxu0 %v4324_v37  ;;  %v4423_v37 = vld [vmem:[#allocation2 + $0x304] ss:$8 sps:$4 sm:$0xff]  }
  0x7c   :  { %1356 = vmatpush1.bf16.msra.mxu0 %v4322_v38  ;;  %v4418_v38 = vld [vmem:[%s5098_s0 + $0x10] ss:$48 sps:$4 sm:$0xff]  }
  0x7d   :  { %1357 = vmatprep.subr.bf16.mxu0 %v4327_v39  ;;  %v4421_v39 = vld [vmem:[#allocation2 + $0x300] ss:$8 sps:$4 sm:$0xff]  }
  0x80   :  { %1358 = vmatpush1.bf16.msra.mxu0 %v4325_v40  ;;  %v4471_v40 = vld [vmem:[%s5098_s0 + $0x1c] ss:$48 sps:$4 sm:$0xff]  }
  0x81   :  { %1359 = vmatprep.subr.bf16.mxu0 %v4330_v41  ;;  %v4426_v41 = vld [vmem:[#allocation2 + $0x314] ss:$8 sps:$4 sm:$0xff]  }
  0x84   :  { %1360 = vmatpush1.bf16.msra.mxu0 %v4328_v42  ;;  %v4424_v42 = vld [vmem:[#allocation2 + $0x310] ss:$8 sps:$4 sm:$0xff]  }
  0x85   :  { %1361 = vmatprep.subr.bf16.mxu0 %v4333_v43  ;;  %v4429_v43 = vld [vmem:[#allocation2 + $0x324] ss:$8 sps:$4 sm:$0xff]  }
  0x88   :  { %1362 = vmatpush1.bf16.msra.mxu0 %v4331_v44  ;;  %v4427_v44 = vld [vmem:[#allocation2 + $0x320] ss:$8 sps:$4 sm:$0xff]  }
  0x89   :  { %1363 = vmatprep.subr.bf16.mxu0 %v4336_v45  ;;  %v4432_v45 = vld [vmem:[#allocation2 + $0x334] ss:$8 sps:$4 sm:$0xff]  }
  0x8c   :  { %1364 = vmatpush1.bf16.msra.mxu0 %v4334_v46  ;;  %v4430_v46 = vld [vmem:[#allocation2 + $0x330] ss:$8 sps:$4 sm:$0xff]  }
  0x8d   :  { %1365 = vmatprep.subr.bf16.mxu0 %v4339_v47  ;;  %v4435_v47 = vld [vmem:[#allocation2 + $0x344] ss:$8 sps:$4 sm:$0xff]  }
  0x90   :  { %1366 = vmatpush1.bf16.msra.mxu0 %v4337_v48  ;;  %v4433_v48 = vld [vmem:[#allocation2 + $0x340] ss:$8 sps:$4 sm:$0xff]  }
  0x91   :  { %1367 = vmatprep.subr.bf16.mxu0 %v4342_v49  ;;  %v4438_v49 = vld [vmem:[#allocation2 + $0x354] ss:$8 sps:$4 sm:$0xff]  }
  0x94   :  { %1368 = vmatpush1.bf16.msra.mxu0 %v4340_v50  ;;  %v4436_v50 = vld [vmem:[#allocation2 + $0x350] ss:$8 sps:$4 sm:$0xff]  }
  0x95   :  { %1369 = vmatprep.subr.bf16.mxu0 %v4345_v51  ;;  %v4441_v51 = vld [vmem:[#allocation2 + $0x364] ss:$8 sps:$4 sm:$0xff]  }
  0x98   :  { %1370 = vmatpush1.bf16.msra.mxu0 %v4343_v52  ;;  %v4439_v52 = vld [vmem:[#allocation2 + $0x360] ss:$8 sps:$4 sm:$0xff]  }
  0x99   :  { %1371 = vmatprep.subr.bf16.mxu0 %v4348_v53  ;;  %v4444_v53 = vld [vmem:[#allocation2 + $0x374] ss:$8 sps:$4 sm:$0xff]  }
  0x9c   :  { %1372 = vmatpush1.bf16.msra.mxu0 %v4346_v54  ;;  %v4442_v54 = vld [vmem:[#allocation2 + $0x370] ss:$8 sps:$4 sm:$0xff]  }
  0x9d   :  { %1373 = vmatprep.subr.bf16.mxu0 %v4351_v55  ;;  %v4447_v55 = vld [vmem:[#allocation2 + $0x384] ss:$8 sps:$4 sm:$0xff]  }
  0xa0   :  { %1374 = vmatpush1.bf16.msra.mxu0 %v4349_v56  ;;  %v4445_v56 = vld [vmem:[#allocation2 + $0x380] ss:$8 sps:$4 sm:$0xff]  }
  0xa1   :  { %1375 = vmatprep.subr.bf16.mxu0 %v4354_v57  ;;  %v4450_v57 = vld [vmem:[#allocation2 + $0x394] ss:$8 sps:$4 sm:$0xff]  }
  0xa4   :  { %1376 = vmatpush1.bf16.msra.mxu0 %v4352_v58  ;;  %v4448_v58 = vld [vmem:[#allocation2 + $0x390] ss:$8 sps:$4 sm:$0xff]  }
  0xa5   :  { %1377 = vmatprep.subr.bf16.mxu0 %v4357_v59  ;;  %v4453_v59 = vld [vmem:[#allocation2 + $0x3a4] ss:$8 sps:$4 sm:$0xff]  }
  0xa8   :  { %1378 = vmatpush1.bf16.msra.mxu0 %v4355_v60  ;;  %v4451_v60 = vld [vmem:[#allocation2 + $0x3a0] ss:$8 sps:$4 sm:$0xff]  }
  0xa9   :  { %1379 = vmatprep.subr.bf16.mxu0 %v4360_v61  ;;  %v4456_v61 = vld [vmem:[#allocation2 + $0x3b4] ss:$8 sps:$4 sm:$0xff]  }
  0xac   :  { %1380 = vmatpush1.bf16.msra.mxu0 %v4358_v62  ;;  %v4454_v62 = vld [vmem:[#allocation2 + $0x3b0] ss:$8 sps:$4 sm:$0xff]  }
  0xad   :  { %1381 = vmatprep.subr.bf16.mxu0 %v4363_v63  ;;  %v4459_v63 = vld [vmem:[#allocation2 + $0x3c4] ss:$8 sps:$4 sm:$0xff]  }
  0xb0   :  { %1382 = vmatpush1.bf16.msra.mxu0 %v4361_v0  ;;  %v4457_v0 = vld [vmem:[#allocation2 + $0x3c0] ss:$8 sps:$4 sm:$0xff]  }
  0xb1   :  { %1383 = vmatprep.subr.bf16.mxu0 %v4366_v1  ;;  %v4462_v1 = vld [vmem:[#allocation2 + $0x3d4] ss:$8 sps:$4 sm:$0xff]  }
  0xb4   :  { %1384 = vmatpush1.bf16.msra.mxu0 %v4364_v2  ;;  %v4460_v2 = vld [vmem:[#allocation2 + $0x3d0] ss:$8 sps:$4 sm:$0xff]  }
  0xb5   :  { %1396 = vmatprep.subr.bf16.mxu0 %v4372_v3  ;;  %v4465_v3 = vld [vmem:[#allocation2 + $0x3e4] ss:$8 sps:$4 sm:$0xff]  }
  0xb7   :  { %1386 = vmatmul.mubr.bf16.vlgmr.msra.gmra.mrb[0].mxu0 %v4367_v4  ;;  %v4463_v4 = vld [vmem:[#allocation2 + $0x3e0] ss:$8 sps:$4 sm:$0xff]  }
  0xb8   :  { %1397 = vmatpush1.bf16.msra.mxu0 %v4370_v5  ;;  %1428 = vmatprep.mubr.bf16.mxu0 %v4420_v6  ;;  %v4468_v5 = vld [vmem:[#allocation2 + $0x3f4] ss:$8 sps:$4 sm:$0xff]   ;;  %v4466_v6 = vld [vmem:[#allocation2 + $0x3f0] ss:$8 sps:$4 sm:$0xff]  }
  0xb9   :  { %1398 = vmatprep.subr.bf16.mxu0 %v4375_v7  ;;  %v4474_v7 = vld [vmem:[#allocation2 + $0x404] ss:$8 sps:$4 sm:$0xff]  }
  0xbc   :  { %1399 = vmatpush1.bf16.msra.mxu0 %v4373_v8  ;;  %v4469_v8 = vld [vmem:[%s5098_s0 + $0x18] ss:$48 sps:$4 sm:$0xff]  }
  0xbd   :  { %1400 = vmatprep.subr.bf16.mxu0 %v4378_v9  ;;  %v4472_v9 = vld [vmem:[#allocation2 + $0x400] ss:$8 sps:$4 sm:$0xff]  }
  0xc0   :  { %1401 = vmatpush1.bf16.msra.mxu0 %v4376_v10  ;;  %v4522_v10 = vld [vmem:[%s5098_s0 + $0x24] ss:$48 sps:$4 sm:$0xff]  }
  0xc1   :  { %1402 = vmatprep.subr.bf16.mxu0 %v4381_v11  ;;  %v4477_v11 = vld [vmem:[#allocation2 + $0x414] ss:$8 sps:$4 sm:$0xff]  }
  0xc4   :  { %1403 = vmatpush1.bf16.msra.mxu0 %v4379_v12  ;;  %v1575_v12 = vld [vmem:[#allocation4 + $0x8] sm:$0xff] }
  0xc5   :  { %1404 = vmatprep.subr.bf16.mxu0 %v4384_v13  ;;  %v1579_v13 = vld [vmem:[#allocation4 + $0x28] sm:$0xff] }
  0xc8   :  { %1405 = vmatpush1.bf16.msra.mxu0 %v4382_v14  ;;  %v4475_v14 = vld [vmem:[#allocation2 + $0x410] ss:$8 sps:$4 sm:$0xff]  }
  0xc9   :  { %1406 = vmatprep.subr.bf16.mxu0 %v4387_v15  ;;  %v3929_v15 = vcombine.high %v1575_v12, %v1579_v13 }
  0xcb   :  { %2427 = vmatprep.subr.bf16.mxu1 %v3929_v15  ;;  %v4510_v15 = vld [vmem:[#allocation2 + $0x4c4] ss:$8 sps:$4 sm:$0xff]  }
  0xcc   :  { %1407 = vmatpush1.bf16.msra.mxu0 %v4385_v16  ;;  %v3928_v16 = vcombine.low %v1575_v12, %v1579_v13  ;;  %v4505_v12 = vld [vmem:[#allocation2 + $0x4b0] ss:$8 sps:$4 sm:$0xff]   ;;  %v1663_v13 = vld [vmem:[#allocation4 + $0x2c8] sm:$0xff] }
  0xcd   :  { %1408 = vmatprep.subr.bf16.mxu0 %v4390_v17  ;;  %v1583_v17 = vld [vmem:[#allocation4 + $0x48] sm:$0xff] }
  0xce   :  { %2428 = vmatpush1.bf16.msra.mxu1 %v3928_v16 }
  0xd0   :  { %1409 = vmatpush1.bf16.msra.mxu0 %v4388_v18  ;;  %v1587_v18 = vld [vmem:[#allocation4 + $0x68] sm:$0xff] }
  0xd1   :  { %1410 = vmatprep.subr.bf16.mxu0 %v4393_v19  ;;  %v4480_v19 = vld [vmem:[#allocation2 + $0x424] ss:$8 sps:$4 sm:$0xff]  }
  0xd4   :  { %1411 = vmatpush1.bf16.msra.mxu0 %v4391_v20  ;;  %v3937_v20 = vcombine.high %v1583_v17, %v1587_v18 }
  0xd5   :  { %1412 = vmatprep.subr.bf16.mxu0 %v4396_v21  ;;  %v3936_v21 = vcombine.low %v1583_v17, %v1587_v18  ;;  %v4508_v18 = vld [vmem:[#allocation2 + $0x4c0] ss:$8 sps:$4 sm:$0xff]  }
  0xd6   :  { %2429 = vmatprep.subr.bf16.mxu1 %v3937_v20  ;;  %v1675_v20 = vld [vmem:[#allocation4 + $0x328] sm:$0xff] }
  0xd7   :  { %2430 = vmatpush1.bf16.msra.mxu1 %v3936_v21  ;;  %v4513_v21 = vld [vmem:[#allocation2 + $0x4d4] ss:$8 sps:$4 sm:$0xff]  }
  0xd8   :  { %1413 = vmatpush1.bf16.msra.mxu0 %v4394_v22  ;;  %v4478_v22 = vld [vmem:[#allocation2 + $0x420] ss:$8 sps:$4 sm:$0xff]  }
  0xd9   :  { %1414 = vmatprep.subr.bf16.mxu0 %v4399_v23  ;;  %v1591_v23 = vld [vmem:[#allocation4 + $0x88] sm:$0xff] }
  0xdc   :  { %1415 = vmatpush1.bf16.msra.mxu0 %v4397_v24  ;;  %v1595_v24 = vld [vmem:[#allocation4 + $0xa8] sm:$0xff] }
  0xdd   :  { %1416 = vmatprep.subr.bf16.mxu0 %v4402_v25  ;;  %v4483_v25 = vld [vmem:[#allocation2 + $0x434] ss:$8 sps:$4 sm:$0xff]  }
  0xe0   :  { %1417 = vmatpush1.bf16.msra.mxu0 %v4400_v26  ;;  %v3945_v26 = vcombine.high %v1591_v23, %v1595_v24 }
  0xe1   :  { %1418 = vmatprep.subr.bf16.mxu0 %v4405_v27  ;;  %v3944_v27 = vcombine.low %v1591_v23, %v1595_v24  ;;  %v4511_v24 = vld [vmem:[#allocation2 + $0x4d0] ss:$8 sps:$4 sm:$0xff]  }
  0xe2   :  { %2431 = vmatprep.subr.bf16.mxu1 %v3945_v26  ;;  %v1683_v26 = vld [vmem:[#allocation4 + $0x368] sm:$0xff] }
  0xe3   :  { %2432 = vmatpush1.bf16.msra.mxu1 %v3944_v27  ;;  %v4516_v27 = vld [vmem:[#allocation2 + $0x4e4] ss:$8 sps:$4 sm:$0xff]  }
  0xe4   :  { %1419 = vmatpush1.bf16.msra.mxu0 %v4403_v28  ;;  %v4481_v28 = vld [vmem:[#allocation2 + $0x430] ss:$8 sps:$4 sm:$0xff]  }
  0xe5   :  { %1420 = vmatprep.subr.bf16.mxu0 %v4408_v29  ;;  %v1599_v29 = vld [vmem:[#allocation4 + $0xc8] sm:$0xff] }
  0xe8   :  { %1421 = vmatpush1.bf16.msra.mxu0 %v4406_v30  ;;  %v1603_v30 = vld [vmem:[#allocation4 + $0xe8] sm:$0xff] }
  0xe9   :  { %1422 = vmatprep.subr.bf16.mxu0 %v4411_v31  ;;  %v4486_v31 = vld [vmem:[#allocation2 + $0x444] ss:$8 sps:$4 sm:$0xff]  }
  0xec   :  { %1423 = vmatpush1.bf16.msra.mxu0 %v4409_v32  ;;  %v3953_v32 = vcombine.high %v1599_v29, %v1603_v30 }
  0xed   :  { %1424 = vmatprep.subr.bf16.mxu0 %v4414_v33  ;;  %v3952_v33 = vcombine.low %v1599_v29, %v1603_v30  ;;  %v4514_v30 = vld [vmem:[#allocation2 + $0x4e0] ss:$8 sps:$4 sm:$0xff]  }
  0xee   :  { %2433 = vmatprep.subr.bf16.mxu1 %v3953_v32  ;;  %v4517_v32 = vld [vmem:[#allocation2 + $0x4f0] ss:$8 sps:$4 sm:$0xff]  }
  0xef   :  { %2434 = vmatpush1.bf16.msra.mxu1 %v3952_v33  ;;  %v4525_v33 = vld [vmem:[#allocation2 + $0x504] ss:$8 sps:$4 sm:$0xff]  }
  0xf0   :  { %1425 = vmatpush1.bf16.msra.mxu0 %v4412_v34  ;;  %v4484_v34 = vld [vmem:[#allocation2 + $0x440] ss:$8 sps:$4 sm:$0xff]  }
  0xf1   :  { %1426 = vmatprep.subr.bf16.mxu0 %v4417_v35  ;;  %v1607_v35 = vld [vmem:[#allocation4 + $0x108] sm:$0xff] }
  0xf4   :  { %1427 = vmatpush1.bf16.msra.mxu0 %v4415_v36  ;;  %v1611_v36 = vld [vmem:[#allocation4 + $0x128] sm:$0xff] }
  0xf5   :  { %1439 = vmatprep.subr.bf16.mxu0 %v4423_v37  ;;  %v4489_v37 = vld [vmem:[#allocation2 + $0x454] ss:$8 sps:$4 sm:$0xff]  }
  0xf7   :  { %1429 = vmatmul.mubr.bf16.vlgmr.msra.gmra.mrb[0].mxu0 %v4418_v38  ;;  %v3961_v38 = vcombine.high %v1607_v35, %v1611_v36 }
  0xf8   :  { %1440 = vmatpush1.bf16.msra.mxu0 %v4421_v39  ;;  %1471 = vmatprep.mubr.bf16.mxu0 %v4471_v40  ;;  %v3960_v39 = vcombine.low %v1607_v35, %v1611_v36  ;;  %v4487_v40 = vld [vmem:[#allocation2 + $0x450] ss:$8 sps:$4 sm:$0xff]   ;;  %v4523_v35 = vld [vmem:[#allocation2 + $0x500] ss:$8 sps:$4 sm:$0xff]   ;;  %v4573_v36 = vld [vmem:[%s5098_s0 + $0x2c] ss:$48 sps:$4 sm:$0xff]  }
  0xf9   :  { %1441 = vmatprep.subr.bf16.mxu0 %v4426_v41  ;;  %2435 = vmatprep.subr.bf16.mxu1 %v3961_v38  ;;  %v1615_v41 = vld [vmem:[#allocation4 + $0x148] sm:$0xff]  ;;  %v4526_v38 = vld [vmem:[#allocation2 + $0x510] ss:$8 sps:$4 sm:$0xff]  }
  0xfa   :  { %2436 = vmatpush1.bf16.msra.mxu1 %v3960_v39  ;;  %v4531_v39 = vld [vmem:[#allocation2 + $0x524] ss:$8 sps:$4 sm:$0xff]  }
  0xfc   :  { %1442 = vmatpush1.bf16.msra.mxu0 %v4424_v42  ;;  %v1619_v42 = vld [vmem:[#allocation4 + $0x168] sm:$0xff] }
  0xfd   :  { %1443 = vmatprep.subr.bf16.mxu0 %v4429_v43  ;;  %v4492_v43 = vld [vmem:[#allocation2 + $0x464] ss:$8 sps:$4 sm:$0xff]  }
 0x100   :  { %1444 = vmatpush1.bf16.msra.mxu0 %v4427_v44  ;;  %v3969_v44 = vcombine.high %v1615_v41, %v1619_v42 }
 0x101   :  { %1445 = vmatprep.subr.bf16.mxu0 %v4432_v45  ;;  %v3968_v45 = vcombine.low %v1615_v41, %v1619_v42  ;;  %v4534_v41 = vld [vmem:[#allocation2 + $0x534] ss:$8 sps:$4 sm:$0xff]   ;;  %v4532_v42 = vld [vmem:[#allocation2 + $0x530] ss:$8 sps:$4 sm:$0xff]  }
 0x102   :  { %2437 = vmatprep.subr.bf16.mxu1 %v3969_v44  ;;  %v4535_v44 = vld [vmem:[#allocation2 + $0x540] ss:$8 sps:$4 sm:$0xff]  }
 0x103   :  { %2438 = vmatpush1.bf16.msra.mxu1 %v3968_v45  ;;  %v4540_v45 = vld [vmem:[#allocation2 + $0x554] ss:$8 sps:$4 sm:$0xff]  }
 0x104   :  { %1446 = vmatpush1.bf16.msra.mxu0 %v4430_v46  ;;  %v4490_v46 = vld [vmem:[#allocation2 + $0x460] ss:$8 sps:$4 sm:$0xff]  }
 0x105   :  { %1447 = vmatprep.subr.bf16.mxu0 %v4435_v47  ;;  %v1623_v47 = vld [vmem:[#allocation4 + $0x188] sm:$0xff] }
 0x108   :  { %1448 = vmatpush1.bf16.msra.mxu0 %v4433_v48  ;;  %v1627_v48 = vld [vmem:[#allocation4 + $0x1a8] sm:$0xff] }
 0x109   :  { %1449 = vmatprep.subr.bf16.mxu0 %v4438_v49  ;;  %v4495_v49 = vld [vmem:[#allocation2 + $0x474] ss:$8 sps:$4 sm:$0xff]  }
 0x10c   :  { %1450 = vmatpush1.bf16.msra.mxu0 %v4436_v50  ;;  %v3977_v50 = vcombine.high %v1623_v47, %v1627_v48 }
 0x10d   :  { %1451 = vmatprep.subr.bf16.mxu0 %v4441_v51  ;;  %v3976_v51 = vcombine.low %v1623_v47, %v1627_v48  ;;  %v4543_v47 = vld [vmem:[#allocation2 + $0x564] ss:$8 sps:$4 sm:$0xff]   ;;  %v4541_v48 = vld [vmem:[#allocation2 + $0x560] ss:$8 sps:$4 sm:$0xff]  }
 0x10e   :  { %2439 = vmatprep.subr.bf16.mxu1 %v3977_v50  ;;  %v4544_v50 = vld [vmem:[#allocation2 + $0x570] ss:$8 sps:$4 sm:$0xff]  }
 0x10f   :  { %2440 = vmatpush1.bf16.msra.mxu1 %v3976_v51  ;;  %v4549_v51 = vld [vmem:[#allocation2 + $0x584] ss:$8 sps:$4 sm:$0xff]  }
 0x110   :  { %1452 = vmatpush1.bf16.msra.mxu0 %v4439_v52  ;;  %v4493_v52 = vld [vmem:[#allocation2 + $0x470] ss:$8 sps:$4 sm:$0xff]  }
 0x111   :  { %1453 = vmatprep.subr.bf16.mxu0 %v4444_v53  ;;  %v1631_v53 = vld [vmem:[#allocation4 + $0x1c8] sm:$0xff] }
 0x114   :  { %1454 = vmatpush1.bf16.msra.mxu0 %v4442_v54  ;;  %v1635_v54 = vld [vmem:[#allocation4 + $0x1e8] sm:$0xff] }
 0x115   :  { %1455 = vmatprep.subr.bf16.mxu0 %v4447_v55  ;;  %v4498_v55 = vld [vmem:[#allocation2 + $0x484] ss:$8 sps:$4 sm:$0xff]  }
 0x118   :  { %1456 = vmatpush1.bf16.msra.mxu0 %v4445_v56  ;;  %v3985_v56 = vcombine.high %v1631_v53, %v1635_v54 }
 0x119   :  { %1457 = vmatprep.subr.bf16.mxu0 %v4450_v57  ;;  %v3984_v57 = vcombine.low %v1631_v53, %v1635_v54  ;;  %v4552_v53 = vld [vmem:[#allocation2 + $0x594] ss:$8 sps:$4 sm:$0xff]   ;;  %v4550_v54 = vld [vmem:[#allocation2 + $0x590] ss:$8 sps:$4 sm:$0xff]  }
 0x11a   :  { %2441 = vmatprep.subr.bf16.mxu1 %v3985_v56  ;;  %v4553_v56 = vld [vmem:[#allocation2 + $0x5a0] ss:$8 sps:$4 sm:$0xff]  }
 0x11b   :  { %2442 = vmatpush1.bf16.msra.mxu1 %v3984_v57  ;;  %v4558_v57 = vld [vmem:[#allocation2 + $0x5b4] ss:$8 sps:$4 sm:$0xff]  }
 0x11c   :  { %1458 = vmatpush1.bf16.msra.mxu0 %v4448_v58  ;;  %v4496_v58 = vld [vmem:[#allocation2 + $0x480] ss:$8 sps:$4 sm:$0xff]  }
 0x11d   :  { %1459 = vmatprep.subr.bf16.mxu0 %v4453_v59  ;;  %v1639_v59 = vld [vmem:[#allocation4 + $0x208] sm:$0xff] }
 0x120   :  { %1460 = vmatpush1.bf16.msra.mxu0 %v4451_v60  ;;  %v1643_v60 = vld [vmem:[#allocation4 + $0x228] sm:$0xff] }
 0x121   :  { %1461 = vmatprep.subr.bf16.mxu0 %v4456_v61  ;;  %v4501_v61 = vld [vmem:[#allocation2 + $0x494] ss:$8 sps:$4 sm:$0xff]  }
 0x124   :  { %1462 = vmatpush1.bf16.msra.mxu0 %v4454_v62  ;;  %v3993_v62 = vcombine.high %v1639_v59, %v1643_v60 }
 0x125   :  { %1463 = vmatprep.subr.bf16.mxu0 %v4459_v63  ;;  %v3992_v63 = vcombine.low %v1639_v59, %v1643_v60  ;;  %v4561_v59 = vld [vmem:[#allocation2 + $0x5c4] ss:$8 sps:$4 sm:$0xff]   ;;  %v4559_v60 = vld [vmem:[#allocation2 + $0x5c0] ss:$8 sps:$4 sm:$0xff]  }
 0x126   :  { %2443 = vmatprep.subr.bf16.mxu1 %v3993_v62  ;;  %v4562_v62 = vld [vmem:[#allocation2 + $0x5d0] ss:$8 sps:$4 sm:$0xff]  }
 0x127   :  { %2444 = vmatpush1.bf16.msra.mxu1 %v3992_v63  ;;  %v4567_v63 = vld [vmem:[#allocation2 + $0x5e4] ss:$8 sps:$4 sm:$0xff]  }
 0x128   :  { %1464 = vmatpush1.bf16.msra.mxu0 %v4457_v0  ;;  %v4499_v0 = vld [vmem:[#allocation2 + $0x490] ss:$8 sps:$4 sm:$0xff]  }
 0x129   :  { %1465 = vmatprep.subr.bf16.mxu0 %v4462_v1  ;;  %v1647_v1 = vld [vmem:[#allocation4 + $0x248] sm:$0xff] }
 0x12c   :  { %1466 = vmatpush1.bf16.msra.mxu0 %v4460_v2  ;;  %v1651_v2 = vld [vmem:[#allocation4 + $0x268] sm:$0xff] }
 0x12d   :  { %1467 = vmatprep.subr.bf16.mxu0 %v4465_v3  ;;  %v4504_v3 = vld [vmem:[#allocation2 + $0x4a4] ss:$8 sps:$4 sm:$0xff]  }
 0x130   :  { %1468 = vmatpush1.bf16.msra.mxu0 %v4463_v4  ;;  %v4001_v4 = vcombine.high %v1647_v1, %v1651_v2 }
 0x131   :  { %1469 = vmatprep.subr.bf16.mxu0 %v4468_v5  ;;  %v4000_v5 = vcombine.low %v1647_v1, %v1651_v2  ;;  %v4570_v1 = vld [vmem:[#allocation2 + $0x5f4] ss:$8 sps:$4 sm:$0xff]   ;;  %v1574_v2 = vld [vmem:[#allocation4] sm:$0xff] }
 0x132   :  { %2445 = vmatprep.subr.bf16.mxu1 %v4001_v4  ;;  %v4568_v4 = vld [vmem:[#allocation2 + $0x5f0] ss:$8 sps:$4 sm:$0xff]  }
 0x133   :  { %2446 = vmatpush1.bf16.msra.mxu1 %v4000_v5 }
 0x134   :  { %1470 = vmatpush1.bf16.msra.mxu0 %v4466_v6  ;;  %v4502_v6 = vld [vmem:[#allocation2 + $0x4a0] ss:$8 sps:$4 sm:$0xff]  }
 0x135   :  { %1482 = vmatprep.subr.bf16.mxu0 %v4474_v7  ;;  %v1655_v7 = vld [vmem:[#allocation4 + $0x288] sm:$0xff] }
 0x137   :  { %1472 = vmatmul.mubr.bf16.vlgmr.msra.gmra.mrb[0].mxu0 %v4469_v8  ;;  %v1659_v8 = vld [vmem:[#allocation4 + $0x2a8] sm:$0xff] }
 0x138   :  { %1483 = vmatpush1.bf16.msra.mxu0 %v4472_v9  ;;  %1514 = vmatprep.mubr.bf16.mxu0 %v4522_v10  ;;  %v4507_v9 = vld [vmem:[#allocation2 + $0x4b4] ss:$8 sps:$4 sm:$0xff]   ;;  %v4009_v10 = vcombine.high %v1655_v7, %v1659_v8 }
 0x139   :  { %1484 = vmatprep.subr.bf16.mxu0 %v4477_v11  ;;  %v4008_v11 = vcombine.low %v1655_v7, %v1659_v8  ;;  %v1586_v7 = vld [vmem:[#allocation4 + $0x60] sm:$0xff]  ;;  %v4571_v8 = vld [vmem:[%s5098_s0 + $0x28] ss:$48 sps:$4 sm:$0xff]  }
 0x13a   :  { %2447 = vmatprep.subr.bf16.mxu1 %v4009_v10 }
 0x13b   :  { %2448 = vmatpush1.bf16.msra.mxu1 %v4008_v11  ;;  %v1590_v11 = vld [vmem:[#allocation4 + $0x80] sm:$0xff] }
 0x13c   :  { %1485 = vmatpush1.bf16.msra.mxu0 %v4475_v14  ;;  %v1667_v14 = vld [vmem:[#allocation4 + $0x2e8] sm:$0xff] }
 0x13d   :  { %1486 = vmatprep.subr.bf16.mxu0 %v4480_v19  ;;  %v4017_v16 = vcombine.high %v1663_v13, %v1667_v14  ;;  %v4016_v17 = vcombine.low %v1663_v13, %v1667_v14  ;;  %v1671_v19 = vld [vmem:[#allocation4 + $0x308] sm:$0xff] }
 0x13e   :  { %v4024_v23 = vcombine.low %v1671_v19, %v1675_v20 }
 0x13f   :  { %2449 = vmatprep.subr.bf16.mxu1 %v4017_v16  ;;  %v1602_v16 = vld [vmem:[#allocation4 + $0xe0] sm:$0xff] }
 0x140   :  { %1487 = vmatpush1.bf16.msra.mxu0 %v4478_v22  ;;  %v4025_v22 = vcombine.high %v1671_v19, %v1675_v20  ;;  %2450 = vmatpush1.bf16.msra.mxu1 %v4016_v17  ;;  %v1606_v19 = vld [vmem:[#allocation4 + $0x100] sm:$0xff] }
 0x141   :  { %1488 = vmatprep.subr.bf16.mxu0 %v4483_v25  ;;  %v1679_v25 = vld [vmem:[#allocation4 + $0x348] sm:$0xff]  ;;  %v1610_v20 = vld [vmem:[#allocation4 + $0x120] sm:$0xff] }
 0x142   :  { %2451 = vmatprep.subr.bf16.mxu1 %v4025_v22  ;;  %v4032_v29 = vcombine.low %v1679_v25, %v1683_v26  ;;  %v3959_v22 = vcombine.high %v1606_v19, %v1610_v20 }
 0x144   :  { %1489 = vmatpush1.bf16.msra.mxu0 %v4481_v28  ;;  %v4033_v28 = vcombine.high %v1679_v25, %v1683_v26  ;;  %2452 = vmatpush1.bf16.msra.mxu1 %v4024_v23  ;;  %v1614_v23 = vld [vmem:[#allocation4 + $0x140] sm:$0xff]  ;;  %v3958_v25 = vcombine.low %v1606_v19, %v1610_v20 }
 0x145   :  { %1490 = vmatprep.subr.bf16.mxu0 %v4486_v31  ;;  %v4519_v31 = vld [vmem:[#allocation2 + $0x4f4] ss:$8 sps:$4 sm:$0xff]   ;;  %v278_v19 = vld [vmem:[%s5100_s2] sm:$0x3] }
 0x146   :  { %2453 = vmatprep.subr.bf16.mxu1 %v4033_v28  ;;  %v1626_v28 = vld [vmem:[#allocation4 + $0x1a0] sm:$0xff] }
 0x148   :  { %1491 = vmatpush1.bf16.msra.mxu0 %v4484_v34  ;;  %2454 = vmatpush1.bf16.msra.mxu1 %v4032_v29  ;;  %v4520_v34 = vld [vmem:[%s5098_s0 + $0x20] ss:$48 sps:$4 sm:$0xff]  }
 0x149   :  { %1492 = vmatprep.subr.bf16.mxu0 %v4489_v37  ;;  %v4528_v37 = vld [vmem:[#allocation2 + $0x514] ss:$8 sps:$4 sm:$0xff]  }
 0x14c   :  { %1493 = vmatpush1.bf16.msra.mxu0 %v4487_v40  ;;  %v4529_v40 = vld [vmem:[#allocation2 + $0x520] ss:$8 sps:$4 sm:$0xff]  }
 0x14d   :  { %1494 = vmatprep.subr.bf16.mxu0 %v4492_v43  ;;  %v4537_v43 = vld [vmem:[#allocation2 + $0x544] ss:$8 sps:$4 sm:$0xff]  }
 0x150   :  { %1495 = vmatpush1.bf16.msra.mxu0 %v4490_v46  ;;  %v4538_v46 = vld [vmem:[#allocation2 + $0x550] ss:$8 sps:$4 sm:$0xff]  }
 0x151   :  { %1496 = vmatprep.subr.bf16.mxu0 %v4495_v49  ;;  %v4546_v49 = vld [vmem:[#allocation2 + $0x574] ss:$8 sps:$4 sm:$0xff]  }
 0x154   :  { %1497 = vmatpush1.bf16.msra.mxu0 %v4493_v52  ;;  %v4547_v52 = vld [vmem:[#allocation2 + $0x580] ss:$8 sps:$4 sm:$0xff]  }
 0x155   :  { %1498 = vmatprep.subr.bf16.mxu0 %v4498_v55  ;;  %v4555_v55 = vld [vmem:[#allocation2 + $0x5a4] ss:$8 sps:$4 sm:$0xff]  }
 0x158   :  { %1499 = vmatpush1.bf16.msra.mxu0 %v4496_v58  ;;  %v4556_v58 = vld [vmem:[#allocation2 + $0x5b0] ss:$8 sps:$4 sm:$0xff]  }
 0x159   :  { %1500 = vmatprep.subr.bf16.mxu0 %v4501_v61  ;;  %v4564_v61 = vld [vmem:[#allocation2 + $0x5d4] ss:$8 sps:$4 sm:$0xff]  }
 0x15c   :  { %1501 = vmatpush1.bf16.msra.mxu0 %v4499_v0  ;;  %v4565_v0 = vld [vmem:[#allocation2 + $0x5e0] ss:$8 sps:$4 sm:$0xff]  }
 0x15d   :  { %1502 = vmatprep.subr.bf16.mxu0 %v4504_v3  ;;  %v1578_v3 = vld [vmem:[#allocation4 + $0x20] sm:$0xff] }
 0x15e   :  { %v3927_v5 = vcombine.high %v1574_v2, %v1578_v3 }
 0x160   :  { %1503 = vmatpush1.bf16.msra.mxu0 %v4502_v6  ;;  %v1582_v6 = vld [vmem:[#allocation4 + $0x40] sm:$0xff] }
 0x161   :  { %1504 = vmatprep.subr.bf16.mxu0 %v4507_v9  ;;  %v3926_v9 = vcombine.low %v1574_v2, %v1578_v3  ;;  %v3935_v10 = vcombine.high %v1582_v6, %v1586_v7  ;;  %v3934_v13 = vcombine.low %v1582_v6, %v1586_v7  ;;  %v1694_v7 = vld [vmem:[#allocation4 + $0x3c0] sm:$0xff] }
 0x164   :  { %1505 = vmatpush1.bf16.msra.mxu0 %v4505_v12  ;;  %v1594_v12 = vld [vmem:[#allocation4 + $0xa0] sm:$0xff] }
 0x165   :  { %1506 = vmatprep.subr.bf16.mxu0 %v4510_v15  ;;  %v3943_v14 = vcombine.high %v1590_v11, %v1594_v12  ;;  %v1598_v15 = vld [vmem:[#allocation4 + $0xc0] sm:$0xff]  ;;  %v3942_v17 = vcombine.low %v1590_v11, %v1594_v12  ;;  %v1576_v12 = vld [vmem:[#allocation4 + $0x10] sm:$0xff] }
 0x168   :  { %1507 = vmatpush1.bf16.msra.mxu0 %v4508_v18  ;;  %v3951_v18 = vcombine.high %v1598_v15, %v1602_v16 }
 0x169   :  { %1508 = vmatprep.subr.bf16.mxu0 %v4513_v21  ;;  %v3950_v21 = vcombine.low %v1598_v15, %v1602_v16  ;;  %v280_v16 = vlaneseq }
 0x16c   :  { %1509 = vmatpush1.bf16.msra.mxu0 %v4511_v24  ;;  %v1618_v24 = vld [vmem:[#allocation4 + $0x160] sm:$0xff] }
 0x16d   :  { %1510 = vmatprep.subr.bf16.mxu0 %v4516_v27  ;;  %v3967_v26 = vcombine.high %v1614_v23, %v1618_v24  ;;  %v1622_v27 = vld [vmem:[#allocation4 + $0x180] sm:$0xff]  ;;  %v3966_v29 = vcombine.low %v1614_v23, %v1618_v24 }
 0x170   :  { %1511 = vmatpush1.bf16.msra.mxu0 %v4514_v30  ;;  %v3975_v30 = vcombine.high %v1622_v27, %v1626_v28 }
 0x171   :  { %1512 = vmatprep.subr.bf16.mxu0 %v4519_v31  ;;  %v1630_v31 = vld [vmem:[#allocation4 + $0x1c0] sm:$0xff] }
 0x174   :  { %1513 = vmatpush1.bf16.msra.mxu0 %v4517_v32  ;;  %v1634_v32 = vld [vmem:[#allocation4 + $0x1e0] sm:$0xff] }
 0x175   :  { %1525 = vmatprep.subr.bf16.mxu0 %v4525_v33  ;;  %v3974_v33 = vcombine.low %v1622_v27, %v1626_v28 }
 0x177   :  { %1515 = vmatmul.mubr.bf16.vlgmr.msra.gmra.mrb[0].mxu0 %v4520_v34  ;;  %v3983_v34 = vcombine.high %v1630_v31, %v1634_v32 }
 0x178   :  { %1526 = vmatpush1.bf16.msra.mxu0 %v4523_v35  ;;  %1557 = vmatprep.mubr.bf16.mxu0 %v4573_v36  ;;  %v1638_v35 = vld [vmem:[#allocation4 + $0x200] sm:$0xff] }
 0x179   :  { %1527 = vmatprep.subr.bf16.mxu0 %v4528_v37  ;;  %v1642_v36 = vld [vmem:[#allocation4 + $0x220] sm:$0xff]  ;;  %v3982_v37 = vcombine.low %v1630_v31, %v1634_v32 }
 0x17c   :  { %1528 = vmatpush1.bf16.msra.mxu0 %v4526_v38  ;;  %v3991_v38 = vcombine.high %v1638_v35, %v1642_v36 }
 0x17d   :  { %1529 = vmatprep.subr.bf16.mxu0 %v4531_v39  ;;  %v1646_v39 = vld [vmem:[#allocation4 + $0x240] sm:$0xff] }
 0x180   :  { %1530 = vmatpush1.bf16.msra.mxu0 %v4529_v40  ;;  %v1650_v40 = vld [vmem:[#allocation4 + $0x260] sm:$0xff] }
 0x181   :  { %1531 = vmatprep.subr.bf16.mxu0 %v4534_v41  ;;  %v3990_v41 = vcombine.low %v1638_v35, %v1642_v36  ;;  %v1584_v35 = vld [vmem:[#allocation4 + $0x50] sm:$0xff] }
 0x182   :  { %v1588_v36 = vld [vmem:[#allocation4 + $0x70] sm:$0xff] }
 0x184   :  { %1532 = vmatpush1.bf16.msra.mxu0 %v4532_v42  ;;  %v3999_v42 = vcombine.high %v1646_v39, %v1650_v40 }
 0x185   :  { %1533 = vmatprep.subr.bf16.mxu0 %v4537_v43  ;;  %v1654_v43 = vld [vmem:[#allocation4 + $0x280] sm:$0xff] }
 0x188   :  { %1534 = vmatpush1.bf16.msra.mxu0 %v4535_v44  ;;  %v1658_v44 = vld [vmem:[#allocation4 + $0x2a0] sm:$0xff] }
 0x189   :  { %1535 = vmatprep.subr.bf16.mxu0 %v4540_v45  ;;  %v3998_v45 = vcombine.low %v1646_v39, %v1650_v40  ;;  %v3939_v39 = vcombine.high %v1584_v35, %v1588_v36  ;;  %v1592_v40 = vld [vmem:[#allocation4 + $0x90] sm:$0xff] }
 0x18c   :  { %1536 = vmatpush1.bf16.msra.mxu0 %v4538_v46  ;;  %v4007_v46 = vcombine.high %v1654_v43, %v1658_v44 }
 0x18d   :  { %1537 = vmatprep.subr.bf16.mxu0 %v4543_v47  ;;  %v1662_v47 = vld [vmem:[#allocation4 + $0x2c0] sm:$0xff] }
 0x190   :  { %1538 = vmatpush1.bf16.msra.mxu0 %v4541_v48  ;;  %v1666_v48 = vld [vmem:[#allocation4 + $0x2e0] sm:$0xff] }
 0x191   :  { %1539 = vmatprep.subr.bf16.mxu0 %v4546_v49  ;;  %v4006_v49 = vcombine.low %v1654_v43, %v1658_v44  ;;  %v1600_v44 = vld [vmem:[#allocation4 + $0xd0] sm:$0xff] }
 0x194   :  { %1540 = vmatpush1.bf16.msra.mxu0 %v4544_v50  ;;  %v4015_v50 = vcombine.high %v1662_v47, %v1666_v48 }
 0x195   :  { %1541 = vmatprep.subr.bf16.mxu0 %v4549_v51  ;;  %v1670_v51 = vld [vmem:[#allocation4 + $0x300] sm:$0xff] }
 0x198   :  { %1542 = vmatpush1.bf16.msra.mxu0 %v4547_v52  ;;  %v1674_v52 = vld [vmem:[#allocation4 + $0x320] sm:$0xff] }
 0x199   :  { %1543 = vmatprep.subr.bf16.mxu0 %v4552_v53  ;;  %v4014_v53 = vcombine.low %v1662_v47, %v1666_v48  ;;  %v1608_v48 = vld [vmem:[#allocation4 + $0x110] sm:$0xff] }
 0x19c   :  { %1544 = vmatpush1.bf16.msra.mxu0 %v4550_v54  ;;  %v4023_v54 = vcombine.high %v1670_v51, %v1674_v52 }
 0x19d   :  { %1545 = vmatprep.subr.bf16.mxu0 %v4555_v55  ;;  %v1678_v55 = vld [vmem:[#allocation4 + $0x340] sm:$0xff] }
 0x1a0   :  { %1546 = vmatpush1.bf16.msra.mxu0 %v4553_v56  ;;  %v1682_v56 = vld [vmem:[#allocation4 + $0x360] sm:$0xff] }
 0x1a1   :  { %1547 = vmatprep.subr.bf16.mxu0 %v4558_v57  ;;  %v4022_v57 = vcombine.low %v1670_v51, %v1674_v52  ;;  %v1616_v52 = vld [vmem:[#allocation4 + $0x150] sm:$0xff] }
 0x1a4   :  { %1548 = vmatpush1.bf16.msra.mxu0 %v4556_v58  ;;  %v4031_v58 = vcombine.high %v1678_v55, %v1682_v56 }
 0x1a5   :  { %1549 = vmatprep.subr.bf16.mxu0 %v4561_v59  ;;  %v4030_v59 = vcombine.low %v1678_v55, %v1682_v56  ;;  %v1624_v56 = vld [vmem:[#allocation4 + $0x190] sm:$0xff] }
 0x1a8   :  { %1550 = vmatpush1.bf16.msra.mxu0 %v4559_v60  ;;  %v1687_v60 = vld [vmem:[#allocation4 + $0x388] sm:$0xff] }
 0x1a9   :  { %1551 = vmatprep.subr.bf16.mxu0 %v4564_v61  ;;  %v1691_v61 = vld [vmem:[#allocation4 + $0x3a8] sm:$0xff] }
 0x1aa   :  { %v4040_v2 = vcombine.low %v1687_v60, %v1691_v61 }
 0x1ac   :  { %1552 = vmatpush1.bf16.msra.mxu0 %v4562_v62  ;;  %v4041_v62 = vcombine.high %v1687_v60, %v1691_v61  ;;  %v1632_v60 = vld [vmem:[#allocation4 + $0x1d0] sm:$0xff] }
 0x1ad   :  { %1553 = vmatprep.subr.bf16.mxu0 %v4567_v63  ;;  %v1686_v63 = vld [vmem:[#allocation4 + $0x380] sm:$0xff]  ;;  %v1636_v61 = vld [vmem:[#allocation4 + $0x1f0] sm:$0xff] }
 0x1ae   :  { %2455 = vmatprep.subr.bf16.mxu1 %v4041_v62 }
 0x1af   :  { %2456 = vmatpush1.bf16.msra.mxu1 %v4040_v2  ;;  %v3986_v2 = vcombine.low %v1632_v60, %v1636_v61 }
 0x1b0   :  { %1554 = vmatpush1.bf16.msra.mxu0 %v4565_v0  ;;  %v1690_v0 = vld [vmem:[#allocation4 + $0x3a0] sm:$0xff] }
 0x1b1   :  { %1555 = vmatprep.subr.bf16.mxu0 %v4570_v1  ;;  %v4039_v1 = vcombine.high %v1686_v63, %v1690_v0  ;;  %v4038_v3 = vcombine.low %v1686_v63, %v1690_v0  ;;  %v3987_v63 = vcombine.high %v1632_v60, %v1636_v61  ;;  %v1640_v0 = vld [vmem:[#allocation4 + $0x210] sm:$0xff]  ;;  %v1625_v60 = vld [vmem:[#allocation4 + $0x198] sm:$0xff] }
 0x1b2   :  { %v1629_v61 = vld [vmem:[#allocation4 + $0x1b8] sm:$0xff] }
 0x1b4   :  { %1556 = vmatpush1.bf16.msra.mxu0 %v4568_v4  ;;  %v1695_v4 = vld [vmem:[#allocation4 + $0x3c8] sm:$0xff] }
 0x1b5   :  { %2384 = vmatprep.subr.bf16.mxu0 %v3927_v5  ;;  %v1699_v5 = vld [vmem:[#allocation4 + $0x3e8] sm:$0xff] }
 0x1b6   :  { %v4049_v6 = vcombine.high %v1695_v4, %v1699_v5 }
 0x1b7   :  { %1558 = vmatmul.mubr.bf16.vlgmr.msra.gmra.mrb[0].mxu0 %v4571_v8  ;;  %v1698_v8 = vld [vmem:[#allocation4 + $0x3e0] sm:$0xff] }
 0x1b8   :  { %2385 = vmatpush1.bf16.msra.mxu0 %v3926_v9  ;;  %v4047_v9 = vcombine.high %v1694_v7, %v1698_v8  ;;  %2457 = vmatprep.subr.bf16.mxu1 %v4049_v6  ;;  %v4046_v11 = vcombine.low %v1694_v7, %v1698_v8  ;;  %v1656_v8 = vld [vmem:[#allocation4 + $0x290] sm:$0xff] }
 0x1b9   :  { %2386 = vmatprep.subr.bf16.mxu0 %v3935_v10  ;;  %v4048_v10 = vcombine.low %v1695_v4, %v1699_v5  ;;  %v1648_v4 = vld [vmem:[#allocation4 + $0x250] sm:$0xff] }
 0x1ba   :  { %v1652_v5 = vld [vmem:[#allocation4 + $0x270] sm:$0xff] }
 0x1bb   :  { %2458 = vmatpush1.bf16.msra.mxu1 %v4048_v10  ;;  %v4003_v7 = vcombine.high %v1648_v4, %v1652_v5  ;;  %v4002_v10 = vcombine.low %v1648_v4, %v1652_v5  ;;  %v1641_v4 = vld [vmem:[#allocation4 + $0x218] sm:$0xff] }
 0x1bc   :  { %2387 = vmatpush1.bf16.msra.mxu0 %v3934_v13  ;;  %v1580_v13 = vld [vmem:[#allocation4 + $0x30] sm:$0xff]  ;;  %v1645_v5 = vld [vmem:[#allocation4 + $0x238] sm:$0xff] }
 0x1bd   :  { %2388 = vmatprep.subr.bf16.mxu0 %v3943_v14  ;;  %v3931_v14 = vcombine.high %v1576_v12, %v1580_v13  ;;  %v3930_v15 = vcombine.low %v1576_v12, %v1580_v13  ;;  %v1664_v12 = vld [vmem:[#allocation4 + $0x2d0] sm:$0xff] }
 0x1be   :  { %v1668_v13 = vld [vmem:[#allocation4 + $0x2f0] sm:$0xff] }
 0x1bf   :  { %2470 = vmatprep.subr.bf16.mxu1 %v3931_v14 }
 0x1c0   :  { %2389 = vmatpush1.bf16.msra.mxu0 %v3942_v17  ;;  %v4981_v17 = vshrl.u32 %v280_v16, 7  ;;  %v1672_v16 = vld [vmem:[#allocation4 + $0x310] sm:$0xff] }
 0x1c1   :  { %2390 = vmatprep.subr.bf16.mxu0 %v3951_v18 }
 0x1c2   :  { %v4984_v18 = vsub.s32 0, %v4981_v17  ;;  %v4990_v20 = vsub.s32 1, %v4981_v17 }
 0x1c4   :  { %2391 = vmatpush1.bf16.msra.mxu0 %v3950_v21  ;;  %v283_v21 = vrot.slane %v278_v19, %v4984_v18 }
 0x1c5   :  { %2392 = vmatprep.subr.bf16.mxu0 %v3959_v22  ;;  %v287_v22 = vrot.slane %v278_v19, %v4990_v20  ;;  %v1676_v19 = vld [vmem:[#allocation4 + $0x330] sm:$0xff] }
 0x1c8   :  { %2393 = vmatpush1.bf16.msra.mxu0 %v3958_v25 }
 0x1c9   :  { %2394 = vmatprep.subr.bf16.mxu0 %v3967_v26 }
 0x1cc   :  { %2395 = vmatpush1.bf16.msra.mxu0 %v3966_v29 }
 0x1cd   :  { %2396 = vmatprep.subr.bf16.mxu0 %v3975_v30 }
 0x1d0   :  { %2397 = vmatpush1.bf16.msra.mxu0 %v3974_v33 }
 0x1d1   :  { %2398 = vmatprep.subr.bf16.mxu0 %v3983_v34 }
 0x1d4   :  { %2399 = vmatpush1.bf16.msra.mxu0 %v3982_v37 }
 0x1d5   :  { %2400 = vmatprep.subr.bf16.mxu0 %v3991_v38 }
 0x1d8   :  { %2401 = vmatpush1.bf16.msra.mxu0 %v3990_v41  ;;  %v1596_v41 = vld [vmem:[#allocation4 + $0xb0] sm:$0xff] }
 0x1d9   :  { %2402 = vmatprep.subr.bf16.mxu0 %v3999_v42  ;;  %v3938_v42 = vcombine.low %v1584_v35, %v1588_v36  ;;  %v3947_v43 = vcombine.high %v1592_v40, %v1596_v41  ;;  %v1577_v35 = vld [vmem:[#allocation4 + $0x18] sm:$0xff] }
 0x1da   :  { %v1581_v36 = vld [vmem:[#allocation4 + $0x38] sm:$0xff] }
 0x1dc   :  { %2403 = vmatpush1.bf16.msra.mxu0 %v3998_v45  ;;  %v1604_v45 = vld [vmem:[#allocation4 + $0xf0] sm:$0xff] }
 0x1dd   :  { %2404 = vmatprep.subr.bf16.mxu0 %v4007_v46  ;;  %v3946_v46 = vcombine.low %v1592_v40, %v1596_v41  ;;  %v3955_v47 = vcombine.high %v1600_v44, %v1604_v45  ;;  %v3933_v40 = vcombine.high %v1577_v35, %v1581_v36  ;;  %v1585_v41 = vld [vmem:[#allocation4 + $0x58] sm:$0xff] }
 0x1e0   :  { %2405 = vmatpush1.bf16.msra.mxu0 %v4006_v49  ;;  %v1612_v49 = vld [vmem:[#allocation4 + $0x130] sm:$0xff] }
 0x1e1   :  { %2406 = vmatprep.subr.bf16.mxu0 %v4015_v50  ;;  %v3954_v50 = vcombine.low %v1600_v44, %v1604_v45  ;;  %v3963_v51 = vcombine.high %v1608_v48, %v1612_v49  ;;  %v1593_v45 = vld [vmem:[#allocation4 + $0x98] sm:$0xff] }
 0x1e4   :  { %2407 = vmatpush1.bf16.msra.mxu0 %v4014_v53  ;;  %v1620_v53 = vld [vmem:[#allocation4 + $0x170] sm:$0xff] }
 0x1e5   :  { %2408 = vmatprep.subr.bf16.mxu0 %v4023_v54  ;;  %v3962_v54 = vcombine.low %v1608_v48, %v1612_v49  ;;  %v3971_v55 = vcombine.high %v1616_v52, %v1620_v53  ;;  %v1601_v49 = vld [vmem:[#allocation4 + $0xd8] sm:$0xff] }
 0x1e8   :  { %2409 = vmatpush1.bf16.msra.mxu0 %v4022_v57  ;;  %v1628_v57 = vld [vmem:[#allocation4 + $0x1b0] sm:$0xff] }
 0x1e9   :  { %2410 = vmatprep.subr.bf16.mxu0 %v4031_v58  ;;  %v3970_v58 = vcombine.low %v1616_v52, %v1620_v53  ;;  %v3978_v62 = vcombine.low %v1624_v56, %v1628_v57  ;;  %v1609_v53 = vld [vmem:[#allocation4 + $0x118] sm:$0xff] }
 0x1ec   :  { %2411 = vmatpush1.bf16.msra.mxu0 %v4030_v59  ;;  %v3979_v59 = vcombine.high %v1624_v56, %v1628_v57  ;;  %v1617_v57 = vld [vmem:[#allocation4 + $0x158] sm:$0xff] }
 0x1ed   :  { %2412 = vmatprep.subr.bf16.mxu0 %v4039_v1  ;;  %v1644_v1 = vld [vmem:[#allocation4 + $0x230] sm:$0xff] }
 0x1ee   :  { %v3994_v6 = vcombine.low %v1640_v0, %v1644_v1 }
 0x1f0   :  { %2413 = vmatpush1.bf16.msra.mxu0 %v4038_v3  ;;  %v3995_v3 = vcombine.high %v1640_v0, %v1644_v1  ;;  %v1633_v0 = vld [vmem:[#allocation4 + $0x1d8] sm:$0xff] }
 0x1f1   :  { %2414 = vmatprep.subr.bf16.mxu0 %v4047_v9  ;;  %v1660_v9 = vld [vmem:[#allocation4 + $0x2b0] sm:$0xff]  ;;  %v1637_v1 = vld [vmem:[#allocation4 + $0x1f8] sm:$0xff] }
 0x1f2   :  { %v4010_v14 = vcombine.low %v1656_v8, %v1660_v9 }
 0x1f4   :  { %2415 = vmatpush1.bf16.msra.mxu0 %v4046_v11  ;;  %v4011_v11 = vcombine.high %v1656_v8, %v1660_v9  ;;  %v1649_v8 = vld [vmem:[#allocation4 + $0x258] sm:$0xff] }
 0x1f5   :  { %v1653_v9 = vld [vmem:[#allocation4 + $0x278] sm:$0xff] }
 0x28a   :  { %v1559_v23 = vpop.f32.mrb[0].mxu0 }
 0x28b   :  { %v4221_v24 = vadd.f32 %v1559_v23, %v283_v21  ;;  %v1561_v25 = vpop.f32.mrb[1].mxu0  ;;  %v1680_v23 = vld [vmem:[#allocation4 + $0x350] sm:$0xff] }
 0x28c   :  { %v4222_v26 = vadd.f32 %v1561_v25, %v287_v22  ;;  %v1563_v27 = vpop.f32.mrb[2].mxu0  ;;  %v4026_v25 = vcombine.low %v1672_v16, %v1676_v19 }
 0x28d   :  { %v4223_v28 = vadd.f32 %v1563_v27, %v283_v21  ;;  %v1565_v29 = vpop.f32.mrb[3].mxu0  ;;  %v1568_v31 = vmax.f32 %v4221_v24, 0.0  ;;  %v4018_v21 = vcombine.low %v1664_v12, %v1668_v13  ;;  %v1684_v24 = vld [vmem:[#allocation4 + $0x370] sm:$0xff] }
 0x28e   :  { %v4224_v30 = vadd.f32 %v1565_v29, %v287_v22  ;;  %v1569_v33 = vmax.f32 %v4222_v26, 0.0  ;;  %v4027_v22 = vcombine.high %v1672_v16, %v1676_v19  ;;  %v4035_v26 = vcombine.high %v1680_v23, %v1684_v24  ;;  %v1688_v27 = vld [vmem:[#allocation4 + $0x390] sm:$0xff]  ;;  %v1665_v16 = vld [vmem:[#allocation4 + $0x2d8] sm:$0xff] }
 0x28f   :  { %v1570_v32 = vmax.f32 %v4223_v28, 0.0  ;;  %v1692_v28 = vld [vmem:[#allocation4 + $0x3b0] sm:$0xff]  ;;  %v4034_v29 = vcombine.low %v1680_v23, %v1684_v24  ;;  %v1669_v19 = vld [vmem:[#allocation4 + $0x2f8] sm:$0xff] }
 0x290   :  { %v1571_v34 = vmax.f32 %v4224_v30, 0.0  ;;  %v4043_v30 = vcombine.high %v1688_v27, %v1692_v28  ;;  %v1673_v23 = vld [vmem:[#allocation4 + $0x318] sm:$0xff] }
 0x291   :  { %v4994_v37 = vpack.c.bf16 %v1570_v32, %v1568_v31  ;;  %v1696_v31 = vld [vmem:[#allocation4 + $0x3d0] sm:$0xff]  ;;  %v1677_v24 = vld [vmem:[#allocation4 + $0x338] sm:$0xff] }
 0x292   :  { %v4996_v38 = vpack.c.bf16 %v1571_v34, %v1569_v33  ;;  %v1700_v32 = vld [vmem:[#allocation4 + $0x3f0] sm:$0xff]  ;;  %v4042_v33 = vcombine.low %v1688_v27, %v1692_v28  ;;  %v1681_v27 = vld [vmem:[#allocation4 + $0x358] sm:$0xff] }
 0x293   :  { %v4051_v34 = vcombine.high %v1696_v31, %v1700_v32  ;;  %v1685_v28 = vld [vmem:[#allocation4 + $0x378] sm:$0xff] }
 0x294   :  { %2416 = vmatprep.mubr.bf16.mxu0 %v4996_v38  ;;  %2459 = vmatprep.mubr.bf16.mxu1 %v4996_v38 }
 0x295   :  { %2417 = vmatmul.mubr.bf16.vlgmr.msra.gmra.mrb[4].mxu0 %v4994_v37  ;;  %2460 = vmatmul.mubr.bf16.vlgmr.msra.gmra.mrb[0].mxu1 %v4994_v37 }
 0x296   :  { %2471 = vmatpush1.bf16.msra.mxu1 %v3930_v15  ;;  %2502 = vmatprep.mubr.bf16.mxu1 %v4996_v38  ;;  %v4019_v15 = vcombine.high %v1664_v12, %v1668_v13  ;;  %v1657_v12 = vld [vmem:[#allocation4 + $0x298] sm:$0xff] }
 0x297   :  { %2472 = vmatprep.subr.bf16.mxu1 %v3939_v39  ;;  %v4050_v39 = vcombine.low %v1696_v31, %v1700_v32  ;;  %v1661_v13 = vld [vmem:[#allocation4 + $0x2b8] sm:$0xff] }
 0x298   :  { %v1689_v31 = vld [vmem:[#allocation4 + $0x398] sm:$0xff] }
 0x299   :  { %v1693_v32 = vld [vmem:[#allocation4 + $0x3b8] sm:$0xff] }
 0x29a   :  { %2473 = vmatpush1.bf16.msra.mxu1 %v3938_v42  ;;  %v1589_v42 = vld [vmem:[#allocation4 + $0x78] sm:$0xff] }
 0x29b   :  { %2474 = vmatprep.subr.bf16.mxu1 %v3947_v43  ;;  %v3932_v43 = vcombine.low %v1577_v35, %v1581_v36  ;;  %v3941_v44 = vcombine.high %v1585_v41, %v1589_v42  ;;  %v1697_v35 = vld [vmem:[#allocation4 + $0x3d8] sm:$0xff] }
 0x29c   :  { %v1701_v36 = vld [vmem:[#allocation4 + $0x3f8] sm:$0xff] }
 0x29e   :  { %2475 = vmatpush1.bf16.msra.mxu1 %v3946_v46  ;;  %v1597_v46 = vld [vmem:[#allocation4 + $0xb8] sm:$0xff] }
 0x29f   :  { %2476 = vmatprep.subr.bf16.mxu1 %v3955_v47  ;;  %v3940_v47 = vcombine.low %v1585_v41, %v1589_v42  ;;  %v3949_v48 = vcombine.high %v1593_v45, %v1597_v46  ;;  %v4052_v41 = vcombine.low %v1697_v35, %v1701_v36  ;;  %v4576_v42 = vld [vmem:[#allocation6 + $0x4] ss:$8 sps:$4 sm:$0xff]  }
 0x2a2   :  { %2477 = vmatpush1.bf16.msra.mxu1 %v3954_v50  ;;  %v1605_v50 = vld [vmem:[#allocation4 + $0xf8] sm:$0xff] }
 0x2a3   :  { %2478 = vmatprep.subr.bf16.mxu1 %v3963_v51  ;;  %v3948_v51 = vcombine.low %v1593_v45, %v1597_v46  ;;  %v3957_v52 = vcombine.high %v1601_v49, %v1605_v50  ;;  %v4577_v45 = vld [vmem:[#allocation6 + $0x10] ss:$8 sps:$4 sm:$0xff]   ;;  %v4582_v46 = vld [vmem:[#allocation6 + $0x24] ss:$8 sps:$4 sm:$0xff]  }
 0x2a6   :  { %2479 = vmatpush1.bf16.msra.mxu1 %v3962_v54  ;;  %v1613_v54 = vld [vmem:[#allocation4 + $0x138] sm:$0xff] }
 0x2a7   :  { %2480 = vmatprep.subr.bf16.mxu1 %v3971_v55  ;;  %v3956_v55 = vcombine.low %v1601_v49, %v1605_v50  ;;  %v3965_v56 = vcombine.high %v1609_v53, %v1613_v54  ;;  %v4583_v49 = vld [vmem:[#allocation6 + $0x30] ss:$8 sps:$4 sm:$0xff]   ;;  %v4588_v50 = vld [vmem:[#allocation6 + $0x44] ss:$8 sps:$4 sm:$0xff]  }
 0x2aa   :  { %2481 = vmatpush1.bf16.msra.mxu1 %v3970_v58  ;;  %v1621_v58 = vld [vmem:[#allocation4 + $0x178] sm:$0xff] }
 0x2ab   :  { %2482 = vmatprep.subr.bf16.mxu1 %v3979_v59  ;;  %v3964_v59 = vcombine.low %v1609_v53, %v1613_v54  ;;  %v4589_v53 = vld [vmem:[#allocation6 + $0x50] ss:$8 sps:$4 sm:$0xff]   ;;  %v4592_v54 = vld [vmem:[#allocation6 + $0x60] ss:$8 sps:$4 sm:$0xff]  }
 0x2ae   :  { %2483 = vmatpush1.bf16.msra.mxu1 %v3978_v62  ;;  %v3972_v62 = vcombine.low %v1617_v57, %v1621_v58 }
 0x2af   :  { %2484 = vmatprep.subr.bf16.mxu1 %v3987_v63  ;;  %v3981_v63 = vcombine.high %v1625_v60, %v1629_v61 }
 0x2b2   :  { %2485 = vmatpush1.bf16.msra.mxu1 %v3986_v2  ;;  %v3980_v2 = vcombine.low %v1625_v60, %v1629_v61  ;;  %v4606_v60 = vld [vmem:[#allocation6 + $0xa4] ss:$8 sps:$4 sm:$0xff]   ;;  %v4604_v61 = vld [vmem:[#allocation6 + $0xa0] ss:$8 sps:$4 sm:$0xff]  }
 0x2b3   :  { %2486 = vmatprep.subr.bf16.mxu1 %v3995_v3  ;;  %v3989_v3 = vcombine.high %v1633_v0, %v1637_v1 }
 0x2b6   :  { %2487 = vmatpush1.bf16.msra.mxu1 %v3994_v6  ;;  %v3988_v6 = vcombine.low %v1633_v0, %v1637_v1  ;;  %v4612_v0 = vld [vmem:[#allocation6 + $0xc4] ss:$8 sps:$4 sm:$0xff]   ;;  %v4610_v1 = vld [vmem:[#allocation6 + $0xc0] ss:$8 sps:$4 sm:$0xff]  }
 0x2b7   :  { %2488 = vmatprep.subr.bf16.mxu1 %v4003_v7  ;;  %v3997_v7 = vcombine.high %v1641_v4, %v1645_v5 }
 0x2ba   :  { %2489 = vmatpush1.bf16.msra.mxu1 %v4002_v10  ;;  %v3996_v10 = vcombine.low %v1641_v4, %v1645_v5  ;;  %v4618_v4 = vld [vmem:[#allocation6 + $0xe4] ss:$8 sps:$4 sm:$0xff]   ;;  %v4616_v5 = vld [vmem:[#allocation6 + $0xe0] ss:$8 sps:$4 sm:$0xff]  }
 0x2bb   :  { %2490 = vmatprep.subr.bf16.mxu1 %v4011_v11  ;;  %v4005_v11 = vcombine.high %v1649_v8, %v1653_v9 }
 0x2be   :  { %2491 = vmatpush1.bf16.msra.mxu1 %v4010_v14  ;;  %v4004_v14 = vcombine.low %v1649_v8, %v1653_v9  ;;  %v4624_v8 = vld [vmem:[#allocation6 + $0x104] ss:$8 sps:$4 sm:$0xff]   ;;  %v1714_v9 = vsub.s32 2, %v4981_v17 }
 0x2bf   :  { %2492 = vmatprep.subr.bf16.mxu1 %v4019_v15  ;;  %v4013_v15 = vcombine.high %v1657_v12, %v1661_v13 }
 0x2c2   :  { %2493 = vmatpush1.bf16.msra.mxu1 %v4018_v21  ;;  %v4012_v21 = vcombine.low %v1657_v12, %v1661_v13 }
 0x2c3   :  { %2494 = vmatprep.subr.bf16.mxu1 %v4027_v22  ;;  %v4021_v22 = vcombine.high %v1665_v16, %v1669_v19 }
 0x2c6   :  { %2495 = vmatpush1.bf16.msra.mxu1 %v4026_v25  ;;  %v4020_v25 = vcombine.low %v1665_v16, %v1669_v19 }
 0x2c7   :  { %2496 = vmatprep.subr.bf16.mxu1 %v4035_v26  ;;  %v4029_v26 = vcombine.high %v1673_v23, %v1677_v24 }
 0x2ca   :  { %2497 = vmatpush1.bf16.msra.mxu1 %v4034_v29  ;;  %v4028_v29 = vcombine.low %v1673_v23, %v1677_v24 }
 0x2cb   :  { %2498 = vmatprep.subr.bf16.mxu1 %v4043_v30  ;;  %v4037_v30 = vcombine.high %v1681_v27, %v1685_v28 }
 0x2ce   :  { %2499 = vmatpush1.bf16.msra.mxu1 %v4042_v33  ;;  %v4036_v33 = vcombine.low %v1681_v27, %v1685_v28 }
 0x2cf   :  { %2500 = vmatprep.subr.bf16.mxu1 %v4051_v34  ;;  %v4045_v34 = vcombine.high %v1689_v31, %v1693_v32 }
 0x2d2   :  { %2501 = vmatpush1.bf16.msra.mxu1 %v4050_v39  ;;  %v4044_v39 = vcombine.low %v1689_v31, %v1693_v32 }
 0x2d3   :  { %2513 = vmatprep.subr.bf16.mxu1 %v3933_v40  ;;  %v4053_v40 = vcombine.high %v1697_v35, %v1701_v36 }
 0x2d5   :  { %2503 = vmatmul.mubr.bf16.vlgmr.msra.gmra.mrb[4].mxu1 %v4994_v37 }
 0x2d6   :  { %2514 = vmatpush1.bf16.msra.mxu1 %v3932_v43  ;;  %2545 = vmatprep.mubr.bf16.mxu1 %v4996_v38  ;;  %v3973_v38 = vcombine.high %v1617_v57, %v1621_v58  ;;  %v4574_v43 = vld [vmem:[#allocation6] ss:$8 sps:$4 sm:$0xff]   ;;  %v4600_v57 = vld [vmem:[#allocation6 + $0x84] ss:$8 sps:$4 sm:$0xff]  }
 0x2d7   :  { %2515 = vmatprep.subr.bf16.mxu1 %v3941_v44  ;;  %v4579_v44 = vld [vmem:[#allocation6 + $0x14] ss:$8 sps:$4 sm:$0xff]   ;;  %v4598_v58 = vld [vmem:[#allocation6 + $0x80] ss:$8 sps:$4 sm:$0xff]  }
 0x2da   :  { %2516 = vmatpush1.bf16.msra.mxu1 %v3940_v47  ;;  %v4580_v47 = vld [vmem:[#allocation6 + $0x20] ss:$8 sps:$4 sm:$0xff]  }
 0x2db   :  { %2517 = vmatprep.subr.bf16.mxu1 %v3949_v48  ;;  %v4585_v48 = vld [vmem:[#allocation6 + $0x34] ss:$8 sps:$4 sm:$0xff]  }
 0x2de   :  { %2518 = vmatpush1.bf16.msra.mxu1 %v3948_v51  ;;  %v4586_v51 = vld [vmem:[#allocation6 + $0x40] ss:$8 sps:$4 sm:$0xff]  }
 0x2df   :  { %2519 = vmatprep.subr.bf16.mxu1 %v3957_v52  ;;  %v4591_v52 = vld [vmem:[#allocation6 + $0x54] ss:$8 sps:$4 sm:$0xff]  }
 0x2e2   :  { %2520 = vmatpush1.bf16.msra.mxu1 %v3956_v55  ;;  %v4597_v55 = vld [vmem:[#allocation6 + $0x74] ss:$8 sps:$4 sm:$0xff]  }
 0x2e3   :  { %2521 = vmatprep.subr.bf16.mxu1 %v3965_v56  ;;  %v4595_v56 = vld [vmem:[#allocation6 + $0x70] ss:$8 sps:$4 sm:$0xff]  }
 0x2e6   :  { %2522 = vmatpush1.bf16.msra.mxu1 %v3964_v59  ;;  %v4603_v59 = vld [vmem:[#allocation6 + $0x94] ss:$8 sps:$4 sm:$0xff]  }
 0x2e7   :  { %2523 = vmatprep.subr.bf16.mxu1 %v3973_v38  ;;  %v4601_v38 = vld [vmem:[#allocation6 + $0x90] ss:$8 sps:$4 sm:$0xff]  }
 0x2ea   :  { %2524 = vmatpush1.bf16.msra.mxu1 %v3972_v62  ;;  %v4609_v62 = vld [vmem:[#allocation6 + $0xb4] ss:$8 sps:$4 sm:$0xff]  }
 0x2eb   :  { %2525 = vmatprep.subr.bf16.mxu1 %v3981_v63  ;;  %v4607_v63 = vld [vmem:[#allocation6 + $0xb0] ss:$8 sps:$4 sm:$0xff]  }
 0x2ee   :  { %2526 = vmatpush1.bf16.msra.mxu1 %v3980_v2  ;;  %v4615_v2 = vld [vmem:[#allocation6 + $0xd4] ss:$8 sps:$4 sm:$0xff]  }
 0x2ef   :  { %2527 = vmatprep.subr.bf16.mxu1 %v3989_v3  ;;  %v4613_v3 = vld [vmem:[#allocation6 + $0xd0] ss:$8 sps:$4 sm:$0xff]  }
 0x2f2   :  { %2528 = vmatpush1.bf16.msra.mxu1 %v3988_v6  ;;  %v4621_v6 = vld [vmem:[#allocation6 + $0xf4] ss:$8 sps:$4 sm:$0xff]  }
 0x2f3   :  { %2529 = vmatprep.subr.bf16.mxu1 %v3997_v7  ;;  %v4619_v7 = vld [vmem:[#allocation6 + $0xf0] ss:$8 sps:$4 sm:$0xff]  }
 0x2f6   :  { %2530 = vmatpush1.bf16.msra.mxu1 %v3996_v10  ;;  %v5010_v10 = vld [vmem:[%s5102_s4] sm:$0xff] }
 0x2f7   :  { %2531 = vmatprep.subr.bf16.mxu1 %v4005_v11  ;;  %v1718_v11 = vsub.s32 3, %v4981_v17  ;;  %v1707_v12 = vrot.slane %v5010_v10, %v4984_v18  ;;  %v1715_v13 = vrot.slane %v5010_v10, %v1714_v9  ;;  %v1722_v9 = vsub.s32 4, %v4981_v17 }
 0x2fa   :  { %2532 = vmatpush1.bf16.msra.mxu1 %v4004_v14  ;;  %v1711_v14 = vrot.slane %v5010_v10, %v4990_v20 }
 0x2fb   :  { %2533 = vmatprep.subr.bf16.mxu1 %v4013_v15  ;;  %v1719_v15 = vrot.slane %v5010_v10, %v1718_v11  ;;  %v1726_v11 = vsub.s32 5, %v4981_v17 }
 0x2fe   :  { %2534 = vmatpush1.bf16.msra.mxu1 %v4012_v21 }
 0x2ff   :  { %2535 = vmatprep.subr.bf16.mxu1 %v4021_v22 }
 0x302   :  { %2536 = vmatpush1.bf16.msra.mxu1 %v4020_v25 }
 0x303   :  { %2537 = vmatprep.subr.bf16.mxu1 %v4029_v26 }
 0x306   :  { %2538 = vmatpush1.bf16.msra.mxu1 %v4028_v29 }
 0x307   :  { %2539 = vmatprep.subr.bf16.mxu1 %v4037_v30 }
 0x30a   :  { %2540 = vmatpush1.bf16.msra.mxu1 %v4036_v33 }
 0x30b   :  { %2541 = vmatprep.subr.bf16.mxu1 %v4045_v34 }
 0x30e   :  { %2542 = vmatpush1.bf16.msra.mxu1 %v4044_v39 }
 0x30f   :  { %2543 = vmatprep.subr.bf16.mxu1 %v4053_v40 }
 0x312   :  { %2544 = vmatpush1.bf16.msra.mxu1 %v4052_v41 }
 0x313   :  { %3360 = vmatprep.subr.bf16.mxu1 %v4576_v42 }
 0x315   :  { %2546 = vmatmul.mubr.bf16.vlgmr.msra.gmra.mrb[8].mxu1 %v4994_v37  ;;  %v4594_v37 = vld [vmem:[#allocation6 + $0x64] ss:$8 sps:$4 sm:$0xff]  }
 0x316   :  { %3361 = vmatpush1.bf16.msra.mxu1 %v4574_v43 }
 0x317   :  { %3362 = vmatprep.subr.bf16.mxu1 %v4579_v44 }
 0x31a   :  { %3363 = vmatpush1.bf16.msra.mxu1 %v4577_v45 }
 0x31b   :  { %3364 = vmatprep.subr.bf16.mxu1 %v4582_v46 }
 0x31e   :  { %3365 = vmatpush1.bf16.msra.mxu1 %v4580_v47 }
 0x31f   :  { %3366 = vmatprep.subr.bf16.mxu1 %v4585_v48 }
 0x322   :  { %3367 = vmatpush1.bf16.msra.mxu1 %v4583_v49  ;;  %v4622_v49 = vld [vmem:[#allocation6 + $0x100] ss:$8 sps:$4 sm:$0xff]  }
 0x323   :  { %3368 = vmatprep.subr.bf16.mxu1 %v4588_v50  ;;  %v4627_v50 = vld [vmem:[#allocation6 + $0x114] ss:$8 sps:$4 sm:$0xff]  }
 0x326   :  { %3369 = vmatpush1.bf16.msra.mxu1 %v4586_v51  ;;  %v4625_v51 = vld [vmem:[#allocation6 + $0x110] ss:$8 sps:$4 sm:$0xff]  }
 0x327   :  { %3370 = vmatprep.subr.bf16.mxu1 %v4591_v52  ;;  %v4630_v52 = vld [vmem:[#allocation6 + $0x124] ss:$8 sps:$4 sm:$0xff]  }
 0x32a   :  { %3371 = vmatpush1.bf16.msra.mxu1 %v4589_v53  ;;  %v4628_v53 = vld [vmem:[#allocation6 + $0x120] ss:$8 sps:$4 sm:$0xff]  }
 0x32b   :  { %3372 = vmatprep.subr.bf16.mxu1 %v4594_v37  ;;  %v4633_v37 = vld [vmem:[#allocation6 + $0x134] ss:$8 sps:$4 sm:$0xff]  }
 0x32e   :  { %3373 = vmatpush1.bf16.msra.mxu1 %v4592_v54  ;;  %v4631_v54 = vld [vmem:[#allocation6 + $0x130] ss:$8 sps:$4 sm:$0xff]  }
 0x32f   :  { %3374 = vmatprep.subr.bf16.mxu1 %v4597_v55  ;;  %v4636_v55 = vld [vmem:[#allocation6 + $0x144] ss:$8 sps:$4 sm:$0xff]  }
 0x332   :  { %3375 = vmatpush1.bf16.msra.mxu1 %v4595_v56  ;;  %v4634_v56 = vld [vmem:[#allocation6 + $0x140] ss:$8 sps:$4 sm:$0xff]  }
 0x333   :  { %3376 = vmatprep.subr.bf16.mxu1 %v4600_v57  ;;  %v4639_v57 = vld [vmem:[#allocation6 + $0x154] ss:$8 sps:$4 sm:$0xff]  }
 0x336   :  { %3377 = vmatpush1.bf16.msra.mxu1 %v4598_v58  ;;  %v4637_v58 = vld [vmem:[#allocation6 + $0x150] ss:$8 sps:$4 sm:$0xff]  }
 0x337   :  { %3378 = vmatprep.subr.bf16.mxu1 %v4603_v59  ;;  %v4642_v59 = vld [vmem:[#allocation6 + $0x164] ss:$8 sps:$4 sm:$0xff]  }
 0x33a   :  { %3379 = vmatpush1.bf16.msra.mxu1 %v4601_v38  ;;  %v4640_v38 = vld [vmem:[#allocation6 + $0x160] ss:$8 sps:$4 sm:$0xff]  }
 0x33b   :  { %3380 = vmatprep.subr.bf16.mxu1 %v4606_v60  ;;  %v4645_v60 = vld [vmem:[#allocation6 + $0x174] ss:$8 sps:$4 sm:$0xff]  }
 0x33e   :  { %3381 = vmatpush1.bf16.msra.mxu1 %v4604_v61  ;;  %v4643_v61 = vld [vmem:[#allocation6 + $0x170] ss:$8 sps:$4 sm:$0xff]  }
 0x33f   :  { %3382 = vmatprep.subr.bf16.mxu1 %v4609_v62  ;;  %v4648_v62 = vld [vmem:[#allocation6 + $0x184] ss:$8 sps:$4 sm:$0xff]  }
 0x342   :  { %3383 = vmatpush1.bf16.msra.mxu1 %v4607_v63  ;;  %v4646_v63 = vld [vmem:[#allocation6 + $0x180] ss:$8 sps:$4 sm:$0xff]  }
 0x343   :  { %3384 = vmatprep.subr.bf16.mxu1 %v4612_v0  ;;  %v4651_v0 = vld [vmem:[#allocation6 + $0x194] ss:$8 sps:$4 sm:$0xff]  }
 0x346   :  { %3385 = vmatpush1.bf16.msra.mxu1 %v4610_v1  ;;  %v4649_v1 = vld [vmem:[#allocation6 + $0x190] ss:$8 sps:$4 sm:$0xff]  }
 0x347   :  { %3386 = vmatprep.subr.bf16.mxu1 %v4615_v2  ;;  %v4654_v2 = vld [vmem:[#allocation6 + $0x1a4] ss:$8 sps:$4 sm:$0xff]  }
 0x34a   :  { %3387 = vmatpush1.bf16.msra.mxu1 %v4613_v3  ;;  %v4652_v3 = vld [vmem:[#allocation6 + $0x1a0] ss:$8 sps:$4 sm:$0xff]  }
 0x34b   :  { %3388 = vmatprep.subr.bf16.mxu1 %v4618_v4  ;;  %v4657_v4 = vld [vmem:[#allocation6 + $0x1b4] ss:$8 sps:$4 sm:$0xff]  }
 0x34e   :  { %3389 = vmatpush1.bf16.msra.mxu1 %v4616_v5  ;;  %v4655_v5 = vld [vmem:[#allocation6 + $0x1b0] ss:$8 sps:$4 sm:$0xff]  }
 0x34f   :  { %3390 = vmatprep.subr.bf16.mxu1 %v4621_v6  ;;  %v4660_v6 = vld [vmem:[#allocation6 + $0x1c4] ss:$8 sps:$4 sm:$0xff]  }
 0x352   :  { %3391 = vmatpush1.bf16.msra.mxu1 %v4619_v7  ;;  %v4658_v7 = vld [vmem:[#allocation6 + $0x1c0] ss:$8 sps:$4 sm:$0xff]  }
 0x353   :  { %3403 = vmatprep.subr.bf16.mxu1 %v4624_v8  ;;  %v4663_v8 = vld [vmem:[#allocation6 + $0x1d4] ss:$8 sps:$4 sm:$0xff]  }
 0x368   :  { %v2418_v16 = vpop.f32.mrb[4].mxu0  ;;  %v2461_v19 = vpop.f32.mrb[0].mxu1 }
 0x369   :  { %v2419_v21 = vadd.f32 %v2418_v16, %v1707_v12  ;;  %v2462_v22 = vadd.f32 %v2461_v19, %v1715_v13  ;;  %v2420_v23 = vpop.f32.mrb[5].mxu0  ;;  %v2463_v24 = vpop.f32.mrb[1].mxu1  ;;  %v4664_v19 = vld [vmem:[#allocation6 + $0x1e0] ss:$8 sps:$4 sm:$0xff]  }
 0x36a   :  { %v2421_v25 = vadd.f32 %v2420_v23, %v1711_v14  ;;  %v2464_v26 = vadd.f32 %v2463_v24, %v1719_v15  ;;  %v2422_v27 = vpop.f32.mrb[6].mxu0  ;;  %v2465_v28 = vpop.f32.mrb[2].mxu1  ;;  %v4669_v23 = vld [vmem:[#allocation6 + $0x1f4] ss:$8 sps:$4 sm:$0xff]  }
 0x36b   :  { %v2423_v29 = vadd.f32 %v2422_v27, %v1707_v12  ;;  %v2466_v30 = vadd.f32 %v2465_v28, %v1715_v13  ;;  %v2424_v31 = vpop.f32.mrb[7].mxu0  ;;  %v2467_v32 = vpop.f32.mrb[3].mxu1  ;;  %v2556_v35 = vmax.f32 %v2419_v21, 0.0  ;;  %v2558_v36 = vmax.f32 %v2462_v22, 0.0  ;;  %v4661_v12 = vld [vmem:[#allocation6 + $0x1d0] ss:$8 sps:$4 sm:$0xff]  }
 0x36c   :  { %v2425_v33 = vadd.f32 %v2424_v31, %v1711_v14  ;;  %v2468_v34 = vadd.f32 %v2467_v32, %v1719_v15  ;;  %v2557_v41 = vmax.f32 %v2421_v25, 0.0  ;;  %v2559_v42 = vmax.f32 %v2464_v26, 0.0  ;;  %v4666_v14 = vld [vmem:[#allocation6 + $0x1e4] ss:$8 sps:$4 sm:$0xff]  }
 0x36d   :  { %v2564_v39 = vmax.f32 %v2423_v29, 0.0  ;;  %v2566_v40 = vmax.f32 %v2466_v30, 0.0  ;;  %v1723_v13 = vrot.slane %v5010_v10, %v1722_v9  ;;  %v1727_v15 = vrot.slane %v5010_v10, %v1726_v11  ;;  %v4667_v29 = vld [vmem:[#allocation6 + $0x1f0] ss:$8 sps:$4 sm:$0xff]   ;;  %v4672_v32 = vld [vmem:[#allocation6 + $0x204] ss:$8 sps:$4 sm:$0xff]  }
 0x36e   :  { %v2565_v43 = vmax.f32 %v2425_v33, 0.0  ;;  %v2567_v44 = vmax.f32 %v2468_v34, 0.0  ;;  %v4711_v9 = vld [vmem:[#allocation6 + $0x2d4] ss:$8 sps:$4 sm:$0xff]   ;;  %v1730_v11 = vsub.s32 6, %v4981_v17 }
 0x36f   :  { %v2572_v45 = vpack.c.bf16 %v2564_v39, %v2556_v35  ;;  %v5019_v46 = vpack.c.bf16 %v2566_v40, %v2558_v36  ;;  %v4670_v39 = vld [vmem:[#allocation6 + $0x200] ss:$8 sps:$4 sm:$0xff]   ;;  %v4675_v40 = vld [vmem:[#allocation6 + $0x214] ss:$8 sps:$4 sm:$0xff]  }
 0x370   :  { %v2573_v47 = vpack.c.bf16 %v2565_v43, %v2557_v41  ;;  %v2575_v48 = vpack.c.bf16 %v2567_v44, %v2559_v42  ;;  %v4766_v41 = vld [vmem:[%s5105_s7 + $0x40] sm:$0xff]   ;;  %v4768_v43 = vld [vmem:[%s5105_s7 + $0x48] sm:$0xff]   ;;  %v4673_v44 = vld [vmem:[#allocation6 + $0x210] ss:$8 sps:$4 sm:$0xff]  }
 0x371   :  { %v4767_v42 = vld [vmem:[%s5105_s7] sm:$0xff]   ;;  %4199 = vmatprep.subr.bf16.mxu0 %v4766_v41  ;;  %v4721_v41 = vld [vmem:[#allocation6 + $0x310] ss:$8 sps:$4 sm:$0xff]  }
 0x372   :  { %3392 = vmatprep.mubr.bf16.mxu1 %v2573_v47  ;;  %4200 = vmatpush3.bf16.msra.mxu0 %v4767_v42  ;;  %v4770_v47 = vld [vmem:[%s5105_s7 + $0x50] sm:$0xff]   ;;  %v4726_v42 = vld [vmem:[#allocation6 + $0x324] ss:$8 sps:$4 sm:$0xff]  }
 0x373   :  { %3393 = vmatmul.mubr.bf16.vlgmr.msra.gmra.mrb[12].mxu1 %v2572_v45  ;;  %v4678_v45 = vld [vmem:[#allocation6 + $0x224] ss:$8 sps:$4 sm:$0xff]   ;;  %4201 = vmatprep.subr.bf16.mxu0 %v4768_v43  ;;  %v4724_v43 = vld [vmem:[#allocation6 + $0x320] ss:$8 sps:$4 sm:$0xff]  }
 0x374   :  { %3404 = vmatpush1.bf16.msra.mxu1 %v4622_v49  ;;  %3435 = vmatprep.mubr.bf16.mxu1 %v2575_v48  ;;  %v4676_v48 = vld [vmem:[#allocation6 + $0x220] ss:$8 sps:$4 sm:$0xff]   ;;  %v4681_v49 = vld [vmem:[#allocation6 + $0x234] ss:$8 sps:$4 sm:$0xff]  }
 0x375   :  { %3405 = vmatprep.subr.bf16.mxu1 %v4627_v50  ;;  %v4771_v50 = vld [vmem:[%s5105_s7 + $0x10] sm:$0xff]  }
 0x378   :  { %3406 = vmatpush1.bf16.msra.mxu1 %v4625_v51  ;;  %v4772_v51 = vld [vmem:[%s5105_s7 + $0x58] sm:$0xff]  }
 0x379   :  { %3407 = vmatprep.subr.bf16.mxu1 %v4630_v52  ;;  %v4679_v52 = vld [vmem:[#allocation6 + $0x230] ss:$8 sps:$4 sm:$0xff]  }
 0x37c   :  { %3408 = vmatpush1.bf16.msra.mxu1 %v4628_v53  ;;  %v4684_v53 = vld [vmem:[#allocation6 + $0x244] ss:$8 sps:$4 sm:$0xff]  }
 0x37d   :  { %3409 = vmatprep.subr.bf16.mxu1 %v4633_v37  ;;  %v4773_v37 = vld [vmem:[%s5105_s7 + $0x18] sm:$0xff]  }
 0x380   :  { %3410 = vmatpush1.bf16.msra.mxu1 %v4631_v54  ;;  %v4774_v54 = vld [vmem:[%s5105_s7 + $0x60] sm:$0xff]  }
 0x381   :  { %3411 = vmatprep.subr.bf16.mxu1 %v4636_v55  ;;  %v4682_v55 = vld [vmem:[#allocation6 + $0x240] ss:$8 sps:$4 sm:$0xff]  }
 0x384   :  { %3412 = vmatpush1.bf16.msra.mxu1 %v4634_v56  ;;  %v4687_v56 = vld [vmem:[#allocation6 + $0x254] ss:$8 sps:$4 sm:$0xff]  }
 0x385   :  { %3413 = vmatprep.subr.bf16.mxu1 %v4639_v57  ;;  %v4775_v57 = vld [vmem:[%s5105_s7 + $0x20] sm:$0xff]  }
 0x388   :  { %3414 = vmatpush1.bf16.msra.mxu1 %v4637_v58  ;;  %v4776_v58 = vld [vmem:[%s5105_s7 + $0x68] sm:$0xff]  }
 0x389   :  { %3415 = vmatprep.subr.bf16.mxu1 %v4642_v59  ;;  %v4685_v59 = vld [vmem:[#allocation6 + $0x250] ss:$8 sps:$4 sm:$0xff]  }
 0x38c   :  { %3416 = vmatpush1.bf16.msra.mxu1 %v4640_v38  ;;  %v4690_v38 = vld [vmem:[#allocation6 + $0x264] ss:$8 sps:$4 sm:$0xff]  }
 0x38d   :  { %3417 = vmatprep.subr.bf16.mxu1 %v4645_v60  ;;  %v4688_v60 = vld [vmem:[#allocation6 + $0x260] ss:$8 sps:$4 sm:$0xff]  }
 0x390   :  { %3418 = vmatpush1.bf16.msra.mxu1 %v4643_v61  ;;  %v4693_v61 = vld [vmem:[#allocation6 + $0x274] ss:$8 sps:$4 sm:$0xff]  }
 0x391   :  { %3419 = vmatprep.subr.bf16.mxu1 %v4648_v62  ;;  %v4691_v62 = vld [vmem:[#allocation6 + $0x270] ss:$8 sps:$4 sm:$0xff]  }
 0x394   :  { %3420 = vmatpush1.bf16.msra.mxu1 %v4646_v63  ;;  %v4696_v63 = vld [vmem:[#allocation6 + $0x284] ss:$8 sps:$4 sm:$0xff]  }
 0x395   :  { %3421 = vmatprep.subr.bf16.mxu1 %v4651_v0  ;;  %v4694_v0 = vld [vmem:[#allocation6 + $0x280] ss:$8 sps:$4 sm:$0xff]  }
 0x398   :  { %3422 = vmatpush1.bf16.msra.mxu1 %v4649_v1  ;;  %v4699_v1 = vld [vmem:[#allocation6 + $0x294] ss:$8 sps:$4 sm:$0xff]  }
 0x399   :  { %3423 = vmatprep.subr.bf16.mxu1 %v4654_v2  ;;  %v4697_v2 = vld [vmem:[#allocation6 + $0x290] ss:$8 sps:$4 sm:$0xff]  }
 0x39c   :  { %3424 = vmatpush1.bf16.msra.mxu1 %v4652_v3  ;;  %v4702_v3 = vld [vmem:[#allocation6 + $0x2a4] ss:$8 sps:$4 sm:$0xff]  }
 0x39d   :  { %3425 = vmatprep.subr.bf16.mxu1 %v4657_v4  ;;  %v4700_v4 = vld [vmem:[#allocation6 + $0x2a0] ss:$8 sps:$4 sm:$0xff]  }
 0x3a0   :  { %3426 = vmatpush1.bf16.msra.mxu1 %v4655_v5  ;;  %v4705_v5 = vld [vmem:[#allocation6 + $0x2b4] ss:$8 sps:$4 sm:$0xff]  }
 0x3a1   :  { %3427 = vmatprep.subr.bf16.mxu1 %v4660_v6  ;;  %v4703_v6 = vld [vmem:[#allocation6 + $0x2b0] ss:$8 sps:$4 sm:$0xff]  }
 0x3a4   :  { %3428 = vmatpush1.bf16.msra.mxu1 %v4658_v7  ;;  %v4708_v7 = vld [vmem:[#allocation6 + $0x2c4] ss:$8 sps:$4 sm:$0xff]  }
 0x3a5   :  { %3429 = vmatprep.subr.bf16.mxu1 %v4663_v8  ;;  %v4706_v8 = vld [vmem:[#allocation6 + $0x2c0] ss:$8 sps:$4 sm:$0xff]  }
 0x3a8   :  { %v2504_v16 = vpop.f32.mrb[4].mxu1  ;;  %3430 = vmatpush1.bf16.msra.mxu1 %v4661_v12  ;;  %v1734_v12 = vsub.s32 7, %v4981_v17 }
 0x3a9   :  { %v2505_v21 = vadd.f32 %v2504_v16, %v1723_v13  ;;  %v2506_v22 = vpop.f32.mrb[5].mxu1  ;;  %3431 = vmatprep.subr.bf16.mxu1 %v4666_v14  ;;  %v1731_v14 = vrot.slane %v5010_v10, %v1730_v11 }
 0x3aa   :  { %v2507_v24 = vadd.f32 %v2506_v22, %v1727_v15  ;;  %v2508_v25 = vpop.f32.mrb[6].mxu1  ;;  %v1735_v16 = vrot.slane %v5010_v10, %v1734_v12 }
 0x3ab   :  { %v2509_v26 = vadd.f32 %v2508_v25, %v1723_v13  ;;  %v2510_v27 = vpop.f32.mrb[7].mxu1  ;;  %v2560_v30 = vmax.f32 %v2505_v21, 0.0  ;;  %v4709_v13 = vld [vmem:[#allocation6 + $0x2d0] ss:$8 sps:$4 sm:$0xff]   ;;  %v4712_v21 = vld [vmem:[#allocation6 + $0x2e0] ss:$8 sps:$4 sm:$0xff]  }
 0x3ac   :  { %v2511_v28 = vadd.f32 %v2510_v27, %v1727_v15  ;;  %3432 = vmatpush1.bf16.msra.mxu1 %v4664_v19  ;;  %v2561_v33 = vmax.f32 %v2507_v24, 0.0  ;;  %v4714_v15 = vld [vmem:[#allocation6 + $0x2e4] ss:$8 sps:$4 sm:$0xff]   ;;  %v4717_v24 = vld [vmem:[#allocation6 + $0x2f4] ss:$8 sps:$4 sm:$0xff]  }
 0x3ad   :  { %v2568_v31 = vmax.f32 %v2509_v26, 0.0  ;;  %3433 = vmatprep.subr.bf16.mxu1 %v4669_v23 }
 0x3ae   :  { %v2569_v34 = vmax.f32 %v2511_v28, 0.0 }
 0x3af   :  { %v5025_v35 = vpack.c.bf16 %v2568_v31, %v2560_v30 }
 0x3b0   :  { %v2577_v36 = vpack.c.bf16 %v2569_v34, %v2561_v33  ;;  %3434 = vmatpush1.bf16.msra.mxu1 %v4667_v29  ;;  %v4715_v29 = vld [vmem:[#allocation6 + $0x2f0] ss:$8 sps:$4 sm:$0xff]  }
 0x3b1   :  { %3446 = vmatprep.subr.bf16.mxu1 %v4672_v32  ;;  %v4720_v32 = vld [vmem:[#allocation6 + $0x304] ss:$8 sps:$4 sm:$0xff]  }
 0x3b3   :  { %3436 = vmatmul.mubr.bf16.vlgmr.msra.gmra.mrb[12].mxu1 %v5019_v46  ;;  %v4769_v46 = vld [vmem:[%s5105_s7 + $0x8] sm:$0xff]  }
 0x3b4   :  { %3447 = vmatpush1.bf16.msra.mxu1 %v4670_v39  ;;  %3478 = vmatprep.mubr.bf16.mxu1 %v2577_v36  ;;  %v4718_v39 = vld [vmem:[#allocation6 + $0x300] ss:$8 sps:$4 sm:$0xff]  }
 0x3b5   :  { %3448 = vmatprep.subr.bf16.mxu1 %v4675_v40  ;;  %4202 = vmatpush3.bf16.msra.mxu0 %v4769_v46  ;;  %v4723_v40 = vld [vmem:[#allocation6 + $0x314] ss:$8 sps:$4 sm:$0xff]   ;;  %v4732_v46 = vld [vmem:[#allocation6 + $0x344] ss:$8 sps:$4 sm:$0xff]  }
 0x3b6   :  { %4203 = vmatprep.subr.bf16.mxu0 %v4770_v47  ;;  %v4730_v47 = vld [vmem:[#allocation6 + $0x340] ss:$8 sps:$4 sm:$0xff]  }
 0x3b8   :  { %3449 = vmatpush1.bf16.msra.mxu1 %v4673_v44  ;;  %v4729_v44 = vld [vmem:[#allocation6 + $0x334] ss:$8 sps:$4 sm:$0xff]  }
 0x3b9   :  { %3450 = vmatprep.subr.bf16.mxu1 %v4678_v45  ;;  %4204 = vmatpush3.bf16.msra.mxu0 %v4771_v50  ;;  %v4727_v45 = vld [vmem:[#allocation6 + $0x330] ss:$8 sps:$4 sm:$0xff]   ;;  %v4736_v50 = vld [vmem:[#allocation6 + $0x360] ss:$8 sps:$4 sm:$0xff]  }
 0x3ba   :  { %4205 = vmatprep.subr.bf16.mxu0 %v4772_v51  ;;  %v4741_v51 = vld [vmem:[#allocation6 + $0x374] ss:$8 sps:$4 sm:$0xff]  }
 0x3bc   :  { %3451 = vmatpush1.bf16.msra.mxu1 %v4676_v48  ;;  %v4735_v48 = vld [vmem:[#allocation6 + $0x354] ss:$8 sps:$4 sm:$0xff]  }
 0x3bd   :  { %3452 = vmatprep.subr.bf16.mxu1 %v4681_v49  ;;  %4206 = vmatpush3.bf16.msra.mxu0 %v4773_v37  ;;  %v4733_v49 = vld [vmem:[#allocation6 + $0x350] ss:$8 sps:$4 sm:$0xff]   ;;  %v4742_v37 = vld [vmem:[#allocation6 + $0x380] ss:$8 sps:$4 sm:$0xff]  }
 0x3be   :  { %4207 = vmatprep.subr.bf16.mxu0 %v4774_v54  ;;  %v4747_v54 = vld [vmem:[#allocation6 + $0x394] ss:$8 sps:$4 sm:$0xff]  }
 0x3c0   :  { %3453 = vmatpush1.bf16.msra.mxu1 %v4679_v52  ;;  %v4739_v52 = vld [vmem:[#allocation6 + $0x370] ss:$8 sps:$4 sm:$0xff]  }
 0x3c1   :  { %3454 = vmatprep.subr.bf16.mxu1 %v4684_v53  ;;  %4208 = vmatpush3.bf16.msra.mxu0 %v4775_v57  ;;  %v4744_v53 = vld [vmem:[#allocation6 + $0x384] ss:$8 sps:$4 sm:$0xff]   ;;  %v4748_v57 = vld [vmem:[#allocation6 + $0x3a0] ss:$8 sps:$4 sm:$0xff]  }
 0x3c2   :  { %4209 = vmatprep.subr.bf16.mxu0 %v4776_v58  ;;  %v4753_v58 = vld [vmem:[#allocation6 + $0x3b4] ss:$8 sps:$4 sm:$0xff]  }
 0x3c4   :  { %3455 = vmatpush1.bf16.msra.mxu1 %v4682_v55  ;;  %v4745_v55 = vld [vmem:[#allocation6 + $0x390] ss:$8 sps:$4 sm:$0xff]  }
 0x3c5   :  { %3456 = vmatprep.subr.bf16.mxu1 %v4687_v56  ;;  %v4750_v56 = vld [vmem:[#allocation6 + $0x3a4] ss:$8 sps:$4 sm:$0xff]  }
 0x3c8   :  { %3457 = vmatpush1.bf16.msra.mxu1 %v4685_v59  ;;  %v4751_v59 = vld [vmem:[#allocation6 + $0x3b0] ss:$8 sps:$4 sm:$0xff]  }
 0x3c9   :  { %3458 = vmatprep.subr.bf16.mxu1 %v4690_v38  ;;  %v4756_v38 = vld [vmem:[#allocation6 + $0x3c4] ss:$8 sps:$4 sm:$0xff]  }
 0x3cc   :  { %3459 = vmatpush1.bf16.msra.mxu1 %v4688_v60  ;;  %v4754_v60 = vld [vmem:[#allocation6 + $0x3c0] ss:$8 sps:$4 sm:$0xff]  }
 0x3cd   :  { %3460 = vmatprep.subr.bf16.mxu1 %v4693_v61  ;;  %v4759_v61 = vld [vmem:[#allocation6 + $0x3d4] ss:$8 sps:$4 sm:$0xff]  }
 0x3d0   :  { %3461 = vmatpush1.bf16.msra.mxu1 %v4691_v62  ;;  %v4757_v62 = vld [vmem:[#allocation6 + $0x3d0] ss:$8 sps:$4 sm:$0xff]  }
 0x3d1   :  { %3462 = vmatprep.subr.bf16.mxu1 %v4696_v63  ;;  %v4762_v63 = vld [vmem:[#allocation6 + $0x3e4] ss:$8 sps:$4 sm:$0xff]  }
 0x3d4   :  { %3463 = vmatpush1.bf16.msra.mxu1 %v4694_v0  ;;  %v4760_v0 = vld [vmem:[#allocation6 + $0x3e0] ss:$8 sps:$4 sm:$0xff]  }
 0x3d5   :  { %3464 = vmatprep.subr.bf16.mxu1 %v4699_v1  ;;  %v4765_v1 = vld [vmem:[#allocation6 + $0x3f4] ss:$8 sps:$4 sm:$0xff]  }
 0x3d8   :  { %3465 = vmatpush1.bf16.msra.mxu1 %v4697_v2  ;;  %v4763_v2 = vld [vmem:[#allocation6 + $0x3f0] ss:$8 sps:$4 sm:$0xff]  }
 0x3d9   :  { %3466 = vmatprep.subr.bf16.mxu1 %v4702_v3  ;;  %v4777_v3 = vld [vmem:[%s5105_s7 + $0x28] sm:$0xff]  }
 0x3da   :  { %4210 = vmatpush3.bf16.msra.mxu0 %v4777_v3 }
 0x3dc   :  { %3467 = vmatpush1.bf16.msra.mxu1 %v4700_v4  ;;  %v4778_v4 = vld [vmem:[%s5105_s7 + $0x70] sm:$0xff]  }
 0x3dd   :  { %3468 = vmatprep.subr.bf16.mxu1 %v4705_v5  ;;  %v4779_v5 = vld [vmem:[%s5105_s7 + $0x30] sm:$0xff]   ;;  %4211 = vmatprep.subr.bf16.mxu0 %v4778_v4 }
 0x3de   :  { %4212 = vmatpush3.bf16.msra.mxu0 %v4779_v5 }
 0x3e0   :  { %3469 = vmatpush1.bf16.msra.mxu1 %v4703_v6  ;;  %v4780_v6 = vld [vmem:[%s5105_s7 + $0x78] sm:$0xff]  }
 0x3e1   :  { %3470 = vmatprep.subr.bf16.mxu1 %v4708_v7  ;;  %v4781_v7 = vld [vmem:[%s5105_s7 + $0x38] sm:$0xff]   ;;  %4213 = vmatprep.subr.bf16.mxu0 %v4780_v6 }
 0x3e2   :  { %4214 = vmatpush3.bf16.msra.mxu0 %v4781_v7 }
 0x3e4   :  { %3471 = vmatpush1.bf16.msra.mxu1 %v4706_v8  ;;  %v2708_v8 = vld [vmem:[%s5104_s6] sm:$0x3] }
 0x3e5   :  { %3472 = vmatprep.subr.bf16.mxu1 %v4711_v9  ;;  %v2713_v9 = vrot.slane %v2708_v8, %v4984_v18  ;;  %v2717_v11 = vrot.slane %v2708_v8, %v4990_v20  ;;  %v4182_v18 = vld [vmem:[%s5106_s8] ss:$0 sm:$0xff] }
 0x3e8   :  { %v2547_v19 = vpop.f32.mrb[8].mxu1  ;;  %3473 = vmatpush1.bf16.msra.mxu1 %v4709_v13 }
 0x3e9   :  { %v2548_v22 = vadd.f32 %v2547_v19, %v1731_v14  ;;  %v2549_v23 = vpop.f32.mrb[9].mxu1  ;;  %3474 = vmatprep.subr.bf16.mxu1 %v4714_v15 }
 0x3ea   :  { %v2550_v25 = vadd.f32 %v2549_v23, %v1735_v16  ;;  %v2551_v26 = vpop.f32.mrb[10].mxu1 }
 0x3eb   :  { %v2552_v27 = vadd.f32 %v2551_v26, %v1731_v14  ;;  %v2553_v28 = vpop.f32.mrb[11].mxu1  ;;  %v2562_v30 = vmax.f32 %v2548_v22, 0.0 }
 0x3ec   :  { %v2554_v17 = vadd.f32 %v2553_v28, %v1735_v16  ;;  %3475 = vmatpush1.bf16.msra.mxu1 %v4712_v21  ;;  %v2563_v33 = vmax.f32 %v2550_v25, 0.0 }
 0x3ed   :  { %v2570_v31 = vmax.f32 %v2552_v27, 0.0  ;;  %3476 = vmatprep.subr.bf16.mxu1 %v4717_v24 }
 0x3ee   :  { %v2571_v10 = vmax.f32 %v2554_v17, 0.0 }
 0x3ef   :  { %v5065_v34 = vpack.c.bf16 %v2570_v31, %v2562_v30 }
 0x3f0   :  { %v2579_v36 = vpack.c.bf16 %v2571_v10, %v2563_v33  ;;  %3477 = vmatpush1.bf16.msra.mxu1 %v4715_v29 }
 0x3f1   :  { %3489 = vmatprep.subr.bf16.mxu1 %v4720_v32 }
 0x3f3   :  { %3479 = vmatmul.mubr.bf16.vlgmr.msra.gmra.mrb[12].mxu1 %v5025_v35  ;;  %v4738_v35 = vld [vmem:[#allocation6 + $0x364] ss:$8 sps:$4 sm:$0xff]  }
 0x3f4   :  { %3490 = vmatpush1.bf16.msra.mxu1 %v4718_v39  ;;  %3521 = vmatprep.mubr.bf16.mxu1 %v2579_v36 }
 0x3f5   :  { %3491 = vmatprep.subr.bf16.mxu1 %v4723_v40 }
 0x3f8   :  { %3492 = vmatpush1.bf16.msra.mxu1 %v4721_v41 }
 0x3f9   :  { %3493 = vmatprep.subr.bf16.mxu1 %v4726_v42 }
 0x3fc   :  { %3494 = vmatpush1.bf16.msra.mxu1 %v4724_v43 }
 0x3fd   :  { %3495 = vmatprep.subr.bf16.mxu1 %v4729_v44 }
 0x400   :  { %3496 = vmatpush1.bf16.msra.mxu1 %v4727_v45 }
 0x401   :  { %3497 = vmatprep.subr.bf16.mxu1 %v4732_v46 }
 0x404   :  { %3498 = vmatpush1.bf16.msra.mxu1 %v4730_v47 }
 0x405   :  { %3499 = vmatprep.subr.bf16.mxu1 %v4735_v48 }
 0x408   :  { %3500 = vmatpush1.bf16.msra.mxu1 %v4733_v49 }
 0x409   :  { %3501 = vmatprep.subr.bf16.mxu1 %v4738_v35 }
 0x40c   :  { %3502 = vmatpush1.bf16.msra.mxu1 %v4736_v50 }
 0x40d   :  { %3503 = vmatprep.subr.bf16.mxu1 %v4741_v51 }
 0x410   :  { %3504 = vmatpush1.bf16.msra.mxu1 %v4739_v52 }
 0x411   :  { %3505 = vmatprep.subr.bf16.mxu1 %v4744_v53 }
 0x414   :  { %3506 = vmatpush1.bf16.msra.mxu1 %v4742_v37 }
 0x415   :  { %3507 = vmatprep.subr.bf16.mxu1 %v4747_v54 }
 0x418   :  { %3508 = vmatpush1.bf16.msra.mxu1 %v4745_v55 }
 0x419   :  { %3509 = vmatprep.subr.bf16.mxu1 %v4750_v56 }
 0x41c   :  { %3510 = vmatpush1.bf16.msra.mxu1 %v4748_v57 }
 0x41d   :  { %3511 = vmatprep.subr.bf16.mxu1 %v4753_v58 }
 0x420   :  { %3512 = vmatpush1.bf16.msra.mxu1 %v4751_v59 }
 0x421   :  { %3513 = vmatprep.subr.bf16.mxu1 %v4756_v38 }
 0x424   :  { %3514 = vmatpush1.bf16.msra.mxu1 %v4754_v60 }
 0x425   :  { %3515 = vmatprep.subr.bf16.mxu1 %v4759_v61 }
 0x428   :  { %3516 = vmatpush1.bf16.msra.mxu1 %v4757_v62 }
 0x429   :  { %3517 = vmatprep.subr.bf16.mxu1 %v4762_v63 }
 0x42c   :  { %3518 = vmatpush1.bf16.msra.mxu1 %v4760_v0 }
 0x42d   :  { %3519 = vmatprep.subr.bf16.mxu1 %v4765_v1 }
 0x430   :  { %3520 = vmatpush1.bf16.msra.mxu1 %v4763_v2 }
 0x433   :  { %3522 = vmatmul.mubr.bf16.vlgmr.msra.gmra.mrb[12].mxu1 %v5065_v34 }
 0x506   :  { %v3523_v12 = vpop.f32.mrb[12].mxu1 }
 0x507   :  { %v4225_v13 = vadd.f32 %v3523_v12, %v2713_v9  ;;  %v3525_v14 = vpop.f32.mrb[13].mxu1 }
 0x508   :  { %v4226_v15 = vadd.f32 %v3525_v14, %v2717_v11  ;;  %v3527_v16 = vpop.f32.mrb[14].mxu1 }
 0x509   :  { %v4227_v19 = vadd.f32 %v3527_v16, %v2713_v9  ;;  %v3529_v21 = vpop.f32.mrb[15].mxu1  ;;  %v3532_v23 = vmax.f32 %v4225_v13, 0.0 }
 0x50a   :  { %v4228_v22 = vadd.f32 %v3529_v21, %v2717_v11  ;;  %v3533_v25 = vmax.f32 %v4226_v15, 0.0 }
 0x50b   :  { %v3534_v24 = vmax.f32 %v4227_v19, 0.0 }
 0x50c   :  { %v3535_v26 = vmax.f32 %v4228_v22, 0.0 }
 0x50d   :  { %v3536_v27 = vpack.c.bf16 %v3534_v24, %v3532_v23 }
 0x50e   :  { %v3537_v28 = vpack.c.bf16 %v3535_v26, %v3533_v25 }
 0x510   :  { %3705 = vmatprep.mubr.bf16.mxu0 %v3537_v28 }
 0x511   :  { %3706 = vmatmul.mubr.bf16.vlgmr.msra.gmra.mrb[8].mxu0 %v3536_v27 }
 0x5e4   :  { %v4215_v17 = vpop.f32.mrb[8].mxu0 }
 0x5e5   :  { %v4216_v20 = vpop.f32.mrb[9].mxu0 }
 0x5e6   :  { %v4217_v29 = vadd.f32 %v4216_v20, %v4215_v17  ;;  %v4218_v30 = vpop.f32.mrb[10].mxu0 }
 0x5e7   :  { %v4219_v31 = vpop.f32.mrb[11].mxu0 }
 0x5e8   :  { %v3708_v32 = vadd.f32 %v4217_v29, %v4182_v18  ;;  %v4220_v33 = vadd.f32 %v4219_v31, %v4218_v30 }
 0x5ea   :  { %3714 = vst [vmem:[%s5107_s9] sm:$0xff] %v3708_v32  ;;  %v3711_v10 = vadd.f32 %v4220_v33, %v4182_v18 }
 0x5ec   :  { %3715 = vst [vmem:[%s5107_s9 + $0x8] sm:$0xff] %v3711_v10 }
 0x5ed   :  { %3720 = vsyncpa [#allocation3], 1 }
 0x5ee   :  { %3721 = vsyncpa [#allocation5], 1 }

</bundles_post_ra>
